<compile_context>
chip_gen: v7x
topology: tpu7x:2x2x1
jax: 0.10.0
libtpu: 0.0.40
codegen_flags: <defaults>
</compile_context>

<pallas_src>
import math
from functools import partial

import jax
import jax.numpy as jnp
from jax.experimental import pallas as pl
from jax.experimental.pallas import tpu as pltpu


# ---------------------------------------------------------------------------
# helpers (usable both inside Pallas kernels and in the pure-JAX reference)
# ---------------------------------------------------------------------------
def _layer_norm(x, g, b, eps=1e-6):
    mu = jnp.mean(x, axis=-1, keepdims=True)
    var = jnp.mean(jnp.square(x - mu), axis=-1, keepdims=True)
    return (x - mu) * jax.lax.rsqrt(var + eps) * g + b


def _gelu_exact(x):
    # torch.nn.functional.gelu default = exact erf-based GELU
    return 0.5 * x * (1.0 + jax.lax.erf(x * (1.0 / math.sqrt(2.0))))


# ---------------------------------------------------------------------------
# fused Pallas kernel: L encoder blocks + final LayerNorm, one batch element
# per grid step (grid axis is "parallel" -> both v7x TensorCores used).
# ---------------------------------------------------------------------------
def transformer_kernel(x_ref, mask_ref,
                       ln1g_ref, ln1b_ref, wqkv_ref, bqkv_ref, wo_ref, bo_ref,
                       ln2g_ref, ln2b_ref, w1_ref, b1_ref, w2_ref, b2_ref,
                       lnfg_ref, lnfb_ref,
                       o_ref, *, num_layers, num_heads):
    x = x_ref[0]                                   # (S, D) f32
    S, D = x.shape
    hd = D // num_heads
    scale = 1.0 / math.sqrt(hd)
    mask = mask_ref[...]                           # (S, S) additive (0 / -inf) f32

    for l in range(num_layers):                    # static unroll; weights resident in VMEM
        # ---- LayerNorm 1 + fused QKV projection (pre-transposed bf16 weight) ----
        xn = _layer_norm(x, ln1g_ref[l], ln1b_ref[l])
        qkv = jnp.dot(xn.astype(jnp.bfloat16), wqkv_ref[l],
                      preferred_element_type=jnp.float32) + bqkv_ref[l]    # (S, 3D) f32

        # ---- multi-head attention; out-proj folded into per-head partial sums ----
        wo_l = wo_ref[l]                           # (H, hd, D) bf16
        attn = jnp.zeros((S, D), jnp.float32)
        for h in range(num_heads):                 # tiny static unroll over heads
            qh = qkv[:, h * hd:(h + 1) * hd]
            kh = qkv[:, D + h * hd:D + (h + 1) * hd]
            vh = qkv[:, 2 * D + h * hd:2 * D + (h + 1) * hd]
            # NOTE: -inf mask matches torch bool-mask semantics (a fully masked
            # row would NaN in torch as well); causal mask never hits that case.
            s = jnp.dot(qh, kh.T, preferred_element_type=jnp.float32) * scale + mask
            s = s - jnp.max(s, axis=-1, keepdims=True)
            p = jnp.exp(s)
            p = p * pl.reciprocal(jnp.sum(p, axis=-1, keepdims=True), approx=True)
            oh = jnp.dot(p, vh, preferred_element_type=jnp.float32)       # (S, hd)
            attn = attn + jnp.dot(oh.astype(jnp.bfloat16), wo_l[h],
                                  preferred_element_type=jnp.float32)     # (S, D)

        x1 = x + attn + bo_ref[l]                  # residual 1 (+ out-proj bias)

        # ---- LayerNorm 2 + MLP (GELU), pre-transposed bf16 weights ----
        y = _layer_norm(x1, ln2g_ref[l], ln2b_ref[l])
        h1 = jnp.dot(y.astype(jnp.bfloat16), w1_ref[l],
                     preferred_element_type=jnp.float32) + b1_ref[l]
        h1 = _gelu_exact(h1)
        mlp = jnp.dot(h1.astype(jnp.bfloat16), w2_ref[l],
                      preferred_element_type=jnp.float32) + b2_ref[l]
        x = x1 + mlp                               # residual 2

    # ---- final encoder LayerNorm ----
    o_ref[0] = _layer_norm(x, lnfg_ref[...], lnfb_ref[...])


# ---------------------------------------------------------------------------
# wrapper: single pallas_call for the whole transformer
# ---------------------------------------------------------------------------
_PARAM_ORDER = ["ln1g", "ln1b", "wqkv_t", "bqkv", "wo_t", "bo",
                "ln2g", "ln2b", "w1_t", "b1", "w2_t", "b2",
                "lnf_g", "lnf_b"]


def _const_spec(arr):
    # Grid-invariant full-array block (constant index_map -> no re-DMA across steps).
    zeros = (0,) * arr.ndim
    return pl.BlockSpec(arr.shape, lambda b, _z=zeros: _z)


def transformer_forward(x, mask_bool, packed, num_layers, num_heads):
    B, S, D = x.shape
    # PyTorch MultiheadAttention bool attn_mask: True => NOT allowed to attend.
    add_mask = jnp.where(mask_bool, -jnp.inf, 0.0).astype(jnp.float32)
    weights = [packed[k] for k in _PARAM_ORDER]
    in_specs = [pl.BlockSpec((1, S, D), lambda b: (b, 0, 0)),
                pl.BlockSpec((S, S), lambda b: (0, 0))]
    in_specs += [_const_spec(w) for w in weights]
    return pl.pallas_call(
        partial(transformer_kernel, num_layers=num_layers, num_heads=num_heads),
        out_shape=jax.ShapeDtypeStruct((B, S, D), jnp.float32),
        grid=(B,),
        in_specs=in_specs,
        out_specs=pl.BlockSpec((1, S, D), lambda b: (b, 0, 0)),
        compiler_params=pltpu.CompilerParams(dimension_semantics=("parallel",)),
    )(x, add_mask, *weights)


# ---------------------------------------------------------------------------
# parameter init (torch layout) + one-time packing for the kernel
# ---------------------------------------------------------------------------
def init_params(key, D, M, L):
    layers = []
    for _ in range(L):
        key, *ks = jax.random.split(key, 9)
        layers.append(dict(
            ln1g=jnp.ones((1, D), jnp.float32), ln1b=jnp.zeros((1, D), jnp.float32),
            wqkv=0.02 * jax.random.normal(ks[0], (3 * D, D), jnp.float32),   # torch (out,in)
            bqkv=0.02 * jax.random.normal(ks[1], (1, 3 * D), jnp.float32),
            wo=0.02 * jax.random.normal(ks[2], (D, D), jnp.float32),
            bo=0.02 * jax.random.normal(ks[3], (1, D), jnp.float32),
            ln2g=jnp.ones((1, D), jnp.float32), ln2b=jnp.zeros((1, D), jnp.float32),
            w1=0.02 * jax.random.normal(ks[4], (M, D), jnp.float32),
            b1=0.02 * jax.random.normal(ks[5], (1, M), jnp.float32),
            w2=0.02 * jax.random.normal(ks[6], (D, M), jnp.float32),
            b2=0.02 * jax.random.normal(ks[7], (1, D), jnp.float32),
        ))
    lnf_g = jnp.ones((1, D), jnp.float32)
    lnf_b = jnp.zeros((1, D), jnp.float32)
    return layers, lnf_g, lnf_b


def pack_params(layers, lnf_g, lnf_b, num_heads):
    """Stack per-layer weights, pre-transpose them, and cast matmul weights to bf16.

    All layout plumbing happens here (once), never inside the kernel hot path.
    """
    D = layers[0]["wo"].shape[0]
    hd = D // num_heads

    def stack(key):
        return jnp.stack([p[key] for p in layers], axis=0)

    return {
        # LayerNorm params / biases stay f32: (L, 1, dim) for clean broadcasting.
        "ln1g": stack("ln1g"), "ln1b": stack("ln1b"),
        "ln2g": stack("ln2g"), "ln2b": stack("ln2b"),
        "bqkv": stack("bqkv"), "bo": stack("bo"),
        "b1": stack("b1"), "b2": stack("b2"),
        # Matmul weights: pre-transposed so the kernel does plain x @ W, bf16 for MXU.
        "wqkv_t": jnp.stack([p["wqkv"].T for p in layers]).astype(jnp.bfloat16),  # (L, D, 3D)
        "wo_t": jnp.stack([p["wo"].T.reshape(num_heads, hd, D) for p in layers]
                          ).astype(jnp.bfloat16),                                 # (L, H, hd, D)
        "w1_t": jnp.stack([p["w1"].T for p in layers]).astype(jnp.bfloat16),      # (L, D, M)
        "w2_t": jnp.stack([p["w2"].T for p in layers]).astype(jnp.bfloat16),      # (L, M, D)
        "lnf_g": lnf_g, "lnf_b": lnf_b,
    }


# ---------------------------------------------------------------------------
# pure-JAX f32 reference (mirrors the torch forward with eval-mode dropout)
# ---------------------------------------------------------------------------
def ref_block(x, add_mask, p, H):
    B, S, D = x.shape
    hd = D // H
    xn = _layer_norm(x, p["ln1g"][0], p["ln1b"][0])
    qkv = xn @ p["wqkv"].T + p["bqkv"][0]
    q = qkv[..., :D].reshape(B, S, H, hd)
    k = qkv[..., D:2 * D].reshape(B, S, H, hd)
    v = qkv[..., 2 * D:].reshape(B, S, H, hd)
    s = jnp.einsum("bqhd,bkhd->bhqk", q, k) / math.sqrt(hd) + add_mask[None, None]
    a = jax.nn.softmax(s, axis=-1)
    attn = jnp.einsum("bhqk,bkhd->bqhd", a, v).reshape(B, S, D)
    attn = attn @ p["wo"].T + p["bo"][0]
    x1 = x + attn
    y = _layer_norm(x1, p["ln2g"][0], p["ln2b"][0])
    h = _gelu_exact(y @ p["w1"].T + p["b1"][0])
    return x1 + h @ p["w2"].T + p["b2"][0]


def ref_transformer(x, mask_bool, layers, lnf_g, lnf_b, H):
    add_mask = jnp.where(mask_bool, -jnp.inf, 0.0).astype(jnp.float32)
    for p in layers:
        x = ref_block(x, add_mask, p, H)
    return _layer_norm(x, lnf_g[0], lnf_b[0])


# ---------------------------------------------------------------------------
if __name__ == "__main__":
    # token_embedding_size=32, mlp_dim=64, num_attention_heads=4, num_layers=2
    B, S, D, H, M, L = 2, 8, 32, 4, 64, 2

    key = jax.random.PRNGKey(0)
    kx, kp = jax.random.split(key)
    x = jax.random.normal(kx, (B, S, D), jnp.float32)
    # causal mask; True = position NOT allowed to attend (torch bool-mask semantics)
    mask_bool = jnp.triu(jnp.ones((S, S), dtype=bool), k=1)

    layers, lnf_g, lnf_b = init_params(kp, D, M, L)
    packed = pack_params(layers, lnf_g, lnf_b, H)

    out = transformer_forward(x, mask_bool, packed, L, H)
    out = jax.block_until_ready(out)

    # f32 highest-precision reference; kernel runs bf16 matmuls with f32 accumulation,
    # so compare at bf16-level tolerance.
    with jax.default_matmul_precision("highest"):
        ref = ref_transformer(x, mask_bool, layers, lnf_g, lnf_b, H)
    ref = jax.block_until_ready(ref)

    assert out.shape == (B, S, D) and out.dtype == jnp.float32
    max_diff = jnp.max(jnp.abs(out - ref))
    assert jnp.allclose(out, ref, atol=2e-2, rtol=2e-2), f"max abs diff {max_diff}"

    print("KERNEL_OK")
</pallas_src>

<mosaic_0001>
module attributes {stable_mosaic.version = 11 : i64} {
  func.func @transformer_kernel(%arg0: i32, %arg1: memref<1x8x32xf32, #tpu.memory_space<vmem>>, %arg2: memref<8x8xf32, #tpu.memory_space<vmem>>, %arg3: memref<2x1x32xf32, #tpu.memory_space<vmem>>, %arg4: memref<2x1x32xf32, #tpu.memory_space<vmem>>, %arg5: memref<2x32x96xbf16, #tpu.memory_space<vmem>>, %arg6: memref<2x1x96xf32, #tpu.memory_space<vmem>>, %arg7: memref<2x4x8x32xbf16, #tpu.memory_space<vmem>>, %arg8: memref<2x1x32xf32, #tpu.memory_space<vmem>>, %arg9: memref<2x1x32xf32, #tpu.memory_space<vmem>>, %arg10: memref<2x1x32xf32, #tpu.memory_space<vmem>>, %arg11: memref<2x32x64xbf16, #tpu.memory_space<vmem>>, %arg12: memref<2x1x64xf32, #tpu.memory_space<vmem>>, %arg13: memref<2x64x32xbf16, #tpu.memory_space<vmem>>, %arg14: memref<2x1x32xf32, #tpu.memory_space<vmem>>, %arg15: memref<1x32xf32, #tpu.memory_space<vmem>>, %arg16: memref<1x32xf32, #tpu.memory_space<vmem>>, %arg17: memref<1x8x32xf32, #tpu.memory_space<vmem>>) attributes {dimension_semantics = [#tpu.dimension_semantics<parallel>], iteration_bounds = array<i64: 2>, scalar_prefetch = 0 : i64, scratch_operands = 0 : i64, tpu.core_type = #tpu.core_type<tc>, window_params = [{transform_indices = @transform_0, window_bounds = array<i64: 1, 8, 32>}, {pipeline_mode = #tpu.pipeline_mode<synchronous>, transform_indices = @transform_1, window_bounds = array<i64: 8, 8>}, {pipeline_mode = #tpu.pipeline_mode<synchronous>, transform_indices = @transform_2, window_bounds = array<i64: 2, 1, 32>}, {pipeline_mode = #tpu.pipeline_mode<synchronous>, transform_indices = @transform_3, window_bounds = array<i64: 2, 1, 32>}, {pipeline_mode = #tpu.pipeline_mode<synchronous>, transform_indices = @transform_4, window_bounds = array<i64: 2, 32, 96>}, {pipeline_mode = #tpu.pipeline_mode<synchronous>, transform_indices = @transform_5, window_bounds = array<i64: 2, 1, 96>}, {pipeline_mode = #tpu.pipeline_mode<synchronous>, transform_indices = @transform_6, window_bounds = array<i64: 2, 4, 8, 32>}, {pipeline_mode = #tpu.pipeline_mode<synchronous>, transform_indices = @transform_7, window_bounds = array<i64: 2, 1, 32>}, {pipeline_mode = #tpu.pipeline_mode<synchronous>, transform_indices = @transform_8, window_bounds = array<i64: 2, 1, 32>}, {pipeline_mode = #tpu.pipeline_mode<synchronous>, transform_indices = @transform_9, window_bounds = array<i64: 2, 1, 32>}, {pipeline_mode = #tpu.pipeline_mode<synchronous>, transform_indices = @transform_10, window_bounds = array<i64: 2, 32, 64>}, {pipeline_mode = #tpu.pipeline_mode<synchronous>, transform_indices = @transform_11, window_bounds = array<i64: 2, 1, 64>}, {pipeline_mode = #tpu.pipeline_mode<synchronous>, transform_indices = @transform_12, window_bounds = array<i64: 2, 64, 32>}, {pipeline_mode = #tpu.pipeline_mode<synchronous>, transform_indices = @transform_13, window_bounds = array<i64: 2, 1, 32>}, {pipeline_mode = #tpu.pipeline_mode<synchronous>, transform_indices = @transform_14, window_bounds = array<i64: 1, 32>}, {pipeline_mode = #tpu.pipeline_mode<synchronous>, transform_indices = @transform_15, window_bounds = array<i64: 1, 32>}, {transform_indices = @transform_16, window_bounds = array<i64: 1, 8, 32>}]} {
    %c0 = arith.constant 0 : index
    %c0_0 = arith.constant 0 : index
    %c0_1 = arith.constant 0 : index
    %0 = vector.load %arg1[%c0, %c0_0, %c0_1] : memref<1x8x32xf32, #tpu.memory_space<vmem>>, vector<1x8x32xf32>
    %1 = vector.shape_cast %0 : vector<1x8x32xf32> to vector<8x32xf32>
    %c0_2 = arith.constant 0 : index
    %c0_3 = arith.constant 0 : index
    %2 = vector.load %arg2[%c0_2, %c0_3] : memref<8x8xf32, #tpu.memory_space<vmem>>, vector<8x8xf32>
    %c0_4 = arith.constant 0 : index
    %c0_5 = arith.constant 0 : index
    %c0_6 = arith.constant 0 : index
    %3 = vector.load %arg3[%c0_4, %c0_5, %c0_6] : memref<2x1x32xf32, #tpu.memory_space<vmem>>, vector<1x1x32xf32>
    %4 = vector.shape_cast %3 : vector<1x1x32xf32> to vector<1x32xf32>
    %c0_7 = arith.constant 0 : index
    %c0_8 = arith.constant 0 : index
    %c0_9 = arith.constant 0 : index
    %5 = vector.load %arg4[%c0_7, %c0_8, %c0_9] : memref<2x1x32xf32, #tpu.memory_space<vmem>>, vector<1x1x32xf32>
    %6 = vector.shape_cast %5 : vector<1x1x32xf32> to vector<1x32xf32>
    %cst = arith.constant dense<0.000000e+00> : vector<8xf32>
    %7 = vector.multi_reduction <add>, %1, %cst [1] : vector<8x32xf32> to vector<8xf32>
    %8 = vector.shape_cast %7 : vector<8xf32> to vector<8x1xf32>
    %cst_10 = arith.constant 3.200000e+01 : f32
    %9 = vector.broadcast %cst_10 : f32 to vector<8x1xf32>
    %10 = arith.divf %8, %9 : vector<8x1xf32>
    %11 = vector.broadcast %10 : vector<8x1xf32> to vector<8x32xf32>
    %12 = arith.subf %1, %11 : vector<8x32xf32>
    %13 = arith.mulf %12, %12 : vector<8x32xf32>
    %cst_11 = arith.constant dense<0.000000e+00> : vector<8xf32>
    %14 = vector.multi_reduction <add>, %13, %cst_11 [1] : vector<8x32xf32> to vector<8xf32>
    %15 = vector.shape_cast %14 : vector<8xf32> to vector<8x1xf32>
    %cst_12 = arith.constant 3.200000e+01 : f32
    %16 = vector.broadcast %cst_12 : f32 to vector<8x1xf32>
    %17 = arith.divf %15, %16 : vector<8x1xf32>
    %18 = vector.broadcast %10 : vector<8x1xf32> to vector<8x32xf32>
    %19 = arith.subf %1, %18 : vector<8x32xf32>
    %cst_13 = arith.constant 9.99999997E-7 : f32
    %20 = vector.broadcast %cst_13 : f32 to vector<8x1xf32>
    %21 = arith.addf %17, %20 : vector<8x1xf32>
    %22 = math.rsqrt %21 : vector<8x1xf32>
    %23 = vector.broadcast %22 : vector<8x1xf32> to vector<8x32xf32>
    %24 = arith.mulf %19, %23 : vector<8x32xf32>
    %25 = vector.broadcast %4 : vector<1x32xf32> to vector<8x32xf32>
    %26 = arith.mulf %24, %25 : vector<8x32xf32>
    %27 = vector.broadcast %6 : vector<1x32xf32> to vector<8x32xf32>
    %28 = arith.addf %26, %27 : vector<8x32xf32>
    %29 = arith.truncf %28 : vector<8x32xf32> to vector<8x32xbf16>
    %c0_14 = arith.constant 0 : index
    %c0_15 = arith.constant 0 : index
    %c0_16 = arith.constant 0 : index
    %30 = vector.load %arg5[%c0_14, %c0_15, %c0_16] : memref<2x32x96xbf16, #tpu.memory_space<vmem>>, vector<1x32x96xbf16>
    %31 = vector.shape_cast %30 : vector<1x32x96xbf16> to vector<32x96xbf16>
    %cst_17 = arith.constant dense<0.000000e+00> : vector<8x96xf32>
    %32 = tpu.matmul %29, %31, %cst_17 {dimension_numbers = #tpu.dot_dimension_numbers<[1], [0], [0], [1], [0, 0, 1, 1], [], []>} : vector<8x32xbf16>, vector<32x96xbf16>, vector<8x96xf32> -> vector<8x96xf32>
    %c0_18 = arith.constant 0 : index
    %c0_19 = arith.constant 0 : index
    %c0_20 = arith.constant 0 : index
    %33 = vector.load %arg6[%c0_18, %c0_19, %c0_20] : memref<2x1x96xf32, #tpu.memory_space<vmem>>, vector<1x1x96xf32>
    %34 = vector.shape_cast %33 : vector<1x1x96xf32> to vector<1x96xf32>
    %35 = vector.broadcast %34 : vector<1x96xf32> to vector<8x96xf32>
    %36 = arith.addf %32, %35 : vector<8x96xf32>
    %c0_21 = arith.constant 0 : index
    %c0_22 = arith.constant 0 : index
    %c0_23 = arith.constant 0 : index
    %c0_24 = arith.constant 0 : index
    %37 = vector.load %arg7[%c0_21, %c0_22, %c0_23, %c0_24] : memref<2x4x8x32xbf16, #tpu.memory_space<vmem>>, vector<1x4x8x32xbf16>
    %38 = vector.shape_cast %37 : vector<1x4x8x32xbf16> to vector<4x8x32xbf16>
    %cst_25 = arith.constant 0.000000e+00 : f32
    %39 = vector.broadcast %cst_25 : f32 to vector<8x32xf32>
    %40 = vector.extract_strided_slice %36 {offsets = [0, 0], sizes = [8, 8], strides = [1, 1]} : vector<8x96xf32> to vector<8x8xf32>
    %41 = vector.extract_strided_slice %36 {offsets = [0, 32], sizes = [8, 8], strides = [1, 1]} : vector<8x96xf32> to vector<8x8xf32>
    %42 = vector.extract_strided_slice %36 {offsets = [0, 64], sizes = [8, 8], strides = [1, 1]} : vector<8x96xf32> to vector<8x8xf32>
    %43 = tpu.transpose %41, [1, 0] : vector<8x8xf32> -> vector<8x8xf32>
    %cst_26 = arith.constant dense<0.000000e+00> : vector<8x8xf32>
    %44 = tpu.matmul %40, %43, %cst_26 {dimension_numbers = #tpu.dot_dimension_numbers<[1], [0], [0], [1], [0, 0, 1, 1], [], []>} : vector<8x8xf32>, vector<8x8xf32>, vector<8x8xf32> -> vector<8x8xf32>
    %cst_27 = arith.constant 0.353553385 : f32
    %45 = vector.broadcast %cst_27 : f32 to vector<8x8xf32>
    %46 = arith.mulf %44, %45 : vector<8x8xf32>
    %47 = arith.addf %46, %2 : vector<8x8xf32>
    %cst_28 = arith.constant dense<0xFF800000> : vector<8xf32>
    %48 = vector.multi_reduction <maximumf>, %47, %cst_28 [1] : vector<8x8xf32> to vector<8xf32>
    %49 = vector.shape_cast %48 : vector<8xf32> to vector<8x1xf32>
    %50 = vector.broadcast %49 : vector<8x1xf32> to vector<8x8xf32>
    %51 = arith.subf %47, %50 : vector<8x8xf32>
    %52 = math.exp %51 : vector<8x8xf32>
    %cst_29 = arith.constant dense<0.000000e+00> : vector<8xf32>
    %53 = vector.multi_reduction <add>, %52, %cst_29 [1] : vector<8x8xf32> to vector<8xf32>
    %54 = vector.shape_cast %53 : vector<8xf32> to vector<8x1xf32>
    %55 = tpu.reciprocal %54 {approx = true} : vector<8x1xf32> -> vector<8x1xf32>
    %56 = vector.broadcast %55 : vector<8x1xf32> to vector<8x8xf32>
    %57 = arith.mulf %52, %56 : vector<8x8xf32>
    %cst_30 = arith.constant dense<0.000000e+00> : vector<8x8xf32>
    %58 = tpu.matmul %57, %42, %cst_30 {dimension_numbers = #tpu.dot_dimension_numbers<[1], [0], [0], [1], [0, 0, 1, 1], [], []>} : vector<8x8xf32>, vector<8x8xf32>, vector<8x8xf32> -> vector<8x8xf32>
    %59 = arith.truncf %58 : vector<8x8xf32> to vector<8x8xbf16>
    %60 = vector.extract_strided_slice %38 {offsets = [0, 0, 0], sizes = [1, 8, 32], strides = [1, 1, 1]} : vector<4x8x32xbf16> to vector<1x8x32xbf16>
    %61 = vector.shape_cast %60 : vector<1x8x32xbf16> to vector<8x32xbf16>
    %cst_31 = arith.constant dense<0.000000e+00> : vector<8x32xf32>
    %62 = tpu.matmul %59, %61, %cst_31 {dimension_numbers = #tpu.dot_dimension_numbers<[1], [0], [0], [1], [0, 0, 1, 1], [], []>} : vector<8x8xbf16>, vector<8x32xbf16>, vector<8x32xf32> -> vector<8x32xf32>
    %63 = arith.addf %39, %62 : vector<8x32xf32>
    %64 = vector.extract_strided_slice %36 {offsets = [0, 8], sizes = [8, 8], strides = [1, 1]} : vector<8x96xf32> to vector<8x8xf32>
    %65 = vector.extract_strided_slice %36 {offsets = [0, 40], sizes = [8, 8], strides = [1, 1]} : vector<8x96xf32> to vector<8x8xf32>
    %66 = vector.extract_strided_slice %36 {offsets = [0, 72], sizes = [8, 8], strides = [1, 1]} : vector<8x96xf32> to vector<8x8xf32>
    %67 = tpu.transpose %65, [1, 0] : vector<8x8xf32> -> vector<8x8xf32>
    %cst_32 = arith.constant dense<0.000000e+00> : vector<8x8xf32>
    %68 = tpu.matmul %64, %67, %cst_32 {dimension_numbers = #tpu.dot_dimension_numbers<[1], [0], [0], [1], [0, 0, 1, 1], [], []>} : vector<8x8xf32>, vector<8x8xf32>, vector<8x8xf32> -> vector<8x8xf32>
    %cst_33 = arith.constant 0.353553385 : f32
    %69 = vector.broadcast %cst_33 : f32 to vector<8x8xf32>
    %70 = arith.mulf %68, %69 : vector<8x8xf32>
    %71 = arith.addf %70, %2 : vector<8x8xf32>
    %cst_34 = arith.constant dense<0xFF800000> : vector<8xf32>
    %72 = vector.multi_reduction <maximumf>, %71, %cst_34 [1] : vector<8x8xf32> to vector<8xf32>
    %73 = vector.shape_cast %72 : vector<8xf32> to vector<8x1xf32>
    %74 = vector.broadcast %73 : vector<8x1xf32> to vector<8x8xf32>
    %75 = arith.subf %71, %74 : vector<8x8xf32>
    %76 = math.exp %75 : vector<8x8xf32>
    %cst_35 = arith.constant dense<0.000000e+00> : vector<8xf32>
    %77 = vector.multi_reduction <add>, %76, %cst_35 [1] : vector<8x8xf32> to vector<8xf32>
    %78 = vector.shape_cast %77 : vector<8xf32> to vector<8x1xf32>
    %79 = tpu.reciprocal %78 {approx = true} : vector<8x1xf32> -> vector<8x1xf32>
    %80 = vector.broadcast %79 : vector<8x1xf32> to vector<8x8xf32>
    %81 = arith.mulf %76, %80 : vector<8x8xf32>
    %cst_36 = arith.constant dense<0.000000e+00> : vector<8x8xf32>
    %82 = tpu.matmul %81, %66, %cst_36 {dimension_numbers = #tpu.dot_dimension_numbers<[1], [0], [0], [1], [0, 0, 1, 1], [], []>} : vector<8x8xf32>, vector<8x8xf32>, vector<8x8xf32> -> vector<8x8xf32>
    %83 = arith.truncf %82 : vector<8x8xf32> to vector<8x8xbf16>
    %84 = vector.extract_strided_slice %38 {offsets = [1, 0, 0], sizes = [1, 8, 32], strides = [1, 1, 1]} : vector<4x8x32xbf16> to vector<1x8x32xbf16>
    %85 = vector.shape_cast %84 : vector<1x8x32xbf16> to vector<8x32xbf16>
    %cst_37 = arith.constant dense<0.000000e+00> : vector<8x32xf32>
    %86 = tpu.matmul %83, %85, %cst_37 {dimension_numbers = #tpu.dot_dimension_numbers<[1], [0], [0], [1], [0, 0, 1, 1], [], []>} : vector<8x8xbf16>, vector<8x32xbf16>, vector<8x32xf32> -> vector<8x32xf32>
    %87 = arith.addf %63, %86 : vector<8x32xf32>
    %88 = vector.extract_strided_slice %36 {offsets = [0, 16], sizes = [8, 8], strides = [1, 1]} : vector<8x96xf32> to vector<8x8xf32>
    %89 = vector.extract_strided_slice %36 {offsets = [0, 48], sizes = [8, 8], strides = [1, 1]} : vector<8x96xf32> to vector<8x8xf32>
    %90 = vector.extract_strided_slice %36 {offsets = [0, 80], sizes = [8, 8], strides = [1, 1]} : vector<8x96xf32> to vector<8x8xf32>
    %91 = tpu.transpose %89, [1, 0] : vector<8x8xf32> -> vector<8x8xf32>
    %cst_38 = arith.constant dense<0.000000e+00> : vector<8x8xf32>
    %92 = tpu.matmul %88, %91, %cst_38 {dimension_numbers = #tpu.dot_dimension_numbers<[1], [0], [0], [1], [0, 0, 1, 1], [], []>} : vector<8x8xf32>, vector<8x8xf32>, vector<8x8xf32> -> vector<8x8xf32>
    %cst_39 = arith.constant 0.353553385 : f32
    %93 = vector.broadcast %cst_39 : f32 to vector<8x8xf32>
    %94 = arith.mulf %92, %93 : vector<8x8xf32>
    %95 = arith.addf %94, %2 : vector<8x8xf32>
    %cst_40 = arith.constant dense<0xFF800000> : vector<8xf32>
    %96 = vector.multi_reduction <maximumf>, %95, %cst_40 [1] : vector<8x8xf32> to vector<8xf32>
    %97 = vector.shape_cast %96 : vector<8xf32> to vector<8x1xf32>
    %98 = vector.broadcast %97 : vector<8x1xf32> to vector<8x8xf32>
    %99 = arith.subf %95, %98 : vector<8x8xf32>
    %100 = math.exp %99 : vector<8x8xf32>
    %cst_41 = arith.constant dense<0.000000e+00> : vector<8xf32>
    %101 = vector.multi_reduction <add>, %100, %cst_41 [1] : vector<8x8xf32> to vector<8xf32>
    %102 = vector.shape_cast %101 : vector<8xf32> to vector<8x1xf32>
    %103 = tpu.reciprocal %102 {approx = true} : vector<8x1xf32> -> vector<8x1xf32>
    %104 = vector.broadcast %103 : vector<8x1xf32> to vector<8x8xf32>
    %105 = arith.mulf %100, %104 : vector<8x8xf32>
    %cst_42 = arith.constant dense<0.000000e+00> : vector<8x8xf32>
    %106 = tpu.matmul %105, %90, %cst_42 {dimension_numbers = #tpu.dot_dimension_numbers<[1], [0], [0], [1], [0, 0, 1, 1], [], []>} : vector<8x8xf32>, vector<8x8xf32>, vector<8x8xf32> -> vector<8x8xf32>
    %107 = arith.truncf %106 : vector<8x8xf32> to vector<8x8xbf16>
    %108 = vector.extract_strided_slice %38 {offsets = [2, 0, 0], sizes = [1, 8, 32], strides = [1, 1, 1]} : vector<4x8x32xbf16> to vector<1x8x32xbf16>
    %109 = vector.shape_cast %108 : vector<1x8x32xbf16> to vector<8x32xbf16>
    %cst_43 = arith.constant dense<0.000000e+00> : vector<8x32xf32>
    %110 = tpu.matmul %107, %109, %cst_43 {dimension_numbers = #tpu.dot_dimension_numbers<[1], [0], [0], [1], [0, 0, 1, 1], [], []>} : vector<8x8xbf16>, vector<8x32xbf16>, vector<8x32xf32> -> vector<8x32xf32>
    %111 = arith.addf %87, %110 : vector<8x32xf32>
    %112 = vector.extract_strided_slice %36 {offsets = [0, 24], sizes = [8, 8], strides = [1, 1]} : vector<8x96xf32> to vector<8x8xf32>
    %113 = vector.extract_strided_slice %36 {offsets = [0, 56], sizes = [8, 8], strides = [1, 1]} : vector<8x96xf32> to vector<8x8xf32>
    %114 = vector.extract_strided_slice %36 {offsets = [0, 88], sizes = [8, 8], strides = [1, 1]} : vector<8x96xf32> to vector<8x8xf32>
    %115 = tpu.transpose %113, [1, 0] : vector<8x8xf32> -> vector<8x8xf32>
    %cst_44 = arith.constant dense<0.000000e+00> : vector<8x8xf32>
    %116 = tpu.matmul %112, %115, %cst_44 {dimension_numbers = #tpu.dot_dimension_numbers<[1], [0], [0], [1], [0, 0, 1, 1], [], []>} : vector<8x8xf32>, vector<8x8xf32>, vector<8x8xf32> -> vector<8x8xf32>
    %cst_45 = arith.constant 0.353553385 : f32
    %117 = vector.broadcast %cst_45 : f32 to vector<8x8xf32>
    %118 = arith.mulf %116, %117 : vector<8x8xf32>
    %119 = arith.addf %118, %2 : vector<8x8xf32>
    %cst_46 = arith.constant dense<0xFF800000> : vector<8xf32>
    %120 = vector.multi_reduction <maximumf>, %119, %cst_46 [1] : vector<8x8xf32> to vector<8xf32>
    %121 = vector.shape_cast %120 : vector<8xf32> to vector<8x1xf32>
    %122 = vector.broadcast %121 : vector<8x1xf32> to vector<8x8xf32>
    %123 = arith.subf %119, %122 : vector<8x8xf32>
    %124 = math.exp %123 : vector<8x8xf32>
    %cst_47 = arith.constant dense<0.000000e+00> : vector<8xf32>
    %125 = vector.multi_reduction <add>, %124, %cst_47 [1] : vector<8x8xf32> to vector<8xf32>
    %126 = vector.shape_cast %125 : vector<8xf32> to vector<8x1xf32>
    %127 = tpu.reciprocal %126 {approx = true} : vector<8x1xf32> -> vector<8x1xf32>
    %128 = vector.broadcast %127 : vector<8x1xf32> to vector<8x8xf32>
    %129 = arith.mulf %124, %128 : vector<8x8xf32>
    %cst_48 = arith.constant dense<0.000000e+00> : vector<8x8xf32>
    %130 = tpu.matmul %129, %114, %cst_48 {dimension_numbers = #tpu.dot_dimension_numbers<[1], [0], [0], [1], [0, 0, 1, 1], [], []>} : vector<8x8xf32>, vector<8x8xf32>, vector<8x8xf32> -> vector<8x8xf32>
    %131 = arith.truncf %130 : vector<8x8xf32> to vector<8x8xbf16>
    %132 = vector.extract_strided_slice %38 {offsets = [3, 0, 0], sizes = [1, 8, 32], strides = [1, 1, 1]} : vector<4x8x32xbf16> to vector<1x8x32xbf16>
    %133 = vector.shape_cast %132 : vector<1x8x32xbf16> to vector<8x32xbf16>
    %cst_49 = arith.constant dense<0.000000e+00> : vector<8x32xf32>
    %134 = tpu.matmul %131, %133, %cst_49 {dimension_numbers = #tpu.dot_dimension_numbers<[1], [0], [0], [1], [0, 0, 1, 1], [], []>} : vector<8x8xbf16>, vector<8x32xbf16>, vector<8x32xf32> -> vector<8x32xf32>
    %135 = arith.addf %111, %134 : vector<8x32xf32>
    %136 = arith.addf %1, %135 : vector<8x32xf32>
    %c0_50 = arith.constant 0 : index
    %c0_51 = arith.constant 0 : index
    %c0_52 = arith.constant 0 : index
    %137 = vector.load %arg8[%c0_50, %c0_51, %c0_52] : memref<2x1x32xf32, #tpu.memory_space<vmem>>, vector<1x1x32xf32>
    %138 = vector.shape_cast %137 : vector<1x1x32xf32> to vector<1x32xf32>
    %139 = vector.broadcast %138 : vector<1x32xf32> to vector<8x32xf32>
    %140 = arith.addf %136, %139 : vector<8x32xf32>
    %c0_53 = arith.constant 0 : index
    %c0_54 = arith.constant 0 : index
    %c0_55 = arith.constant 0 : index
    %141 = vector.load %arg9[%c0_53, %c0_54, %c0_55] : memref<2x1x32xf32, #tpu.memory_space<vmem>>, vector<1x1x32xf32>
    %142 = vector.shape_cast %141 : vector<1x1x32xf32> to vector<1x32xf32>
    %c0_56 = arith.constant 0 : index
    %c0_57 = arith.constant 0 : index
    %c0_58 = arith.constant 0 : index
    %143 = vector.load %arg10[%c0_56, %c0_57, %c0_58] : memref<2x1x32xf32, #tpu.memory_space<vmem>>, vector<1x1x32xf32>
    %144 = vector.shape_cast %143 : vector<1x1x32xf32> to vector<1x32xf32>
    %cst_59 = arith.constant dense<0.000000e+00> : vector<8xf32>
    %145 = vector.multi_reduction <add>, %140, %cst_59 [1] : vector<8x32xf32> to vector<8xf32>
    %146 = vector.shape_cast %145 : vector<8xf32> to vector<8x1xf32>
    %cst_60 = arith.constant 3.200000e+01 : f32
    %147 = vector.broadcast %cst_60 : f32 to vector<8x1xf32>
    %148 = arith.divf %146, %147 : vector<8x1xf32>
    %149 = vector.broadcast %148 : vector<8x1xf32> to vector<8x32xf32>
    %150 = arith.subf %140, %149 : vector<8x32xf32>
    %151 = arith.mulf %150, %150 : vector<8x32xf32>
    %cst_61 = arith.constant dense<0.000000e+00> : vector<8xf32>
    %152 = vector.multi_reduction <add>, %151, %cst_61 [1] : vector<8x32xf32> to vector<8xf32>
    %153 = vector.shape_cast %152 : vector<8xf32> to vector<8x1xf32>
    %cst_62 = arith.constant 3.200000e+01 : f32
    %154 = vector.broadcast %cst_62 : f32 to vector<8x1xf32>
    %155 = arith.divf %153, %154 : vector<8x1xf32>
    %156 = vector.broadcast %148 : vector<8x1xf32> to vector<8x32xf32>
    %157 = arith.subf %140, %156 : vector<8x32xf32>
    %cst_63 = arith.constant 9.99999997E-7 : f32
    %158 = vector.broadcast %cst_63 : f32 to vector<8x1xf32>
    %159 = arith.addf %155, %158 : vector<8x1xf32>
    %160 = math.rsqrt %159 : vector<8x1xf32>
    %161 = vector.broadcast %160 : vector<8x1xf32> to vector<8x32xf32>
    %162 = arith.mulf %157, %161 : vector<8x32xf32>
    %163 = vector.broadcast %142 : vector<1x32xf32> to vector<8x32xf32>
    %164 = arith.mulf %162, %163 : vector<8x32xf32>
    %165 = vector.broadcast %144 : vector<1x32xf32> to vector<8x32xf32>
    %166 = arith.addf %164, %165 : vector<8x32xf32>
    %167 = arith.truncf %166 : vector<8x32xf32> to vector<8x32xbf16>
    %c0_64 = arith.constant 0 : index
    %c0_65 = arith.constant 0 : index
    %c0_66 = arith.constant 0 : index
    %168 = vector.load %arg11[%c0_64, %c0_65, %c0_66] : memref<2x32x64xbf16, #tpu.memory_space<vmem>>, vector<1x32x64xbf16>
    %169 = vector.shape_cast %168 : vector<1x32x64xbf16> to vector<32x64xbf16>
    %cst_67 = arith.constant dense<0.000000e+00> : vector<8x64xf32>
    %170 = tpu.matmul %167, %169, %cst_67 {dimension_numbers = #tpu.dot_dimension_numbers<[1], [0], [0], [1], [0, 0, 1, 1], [], []>} : vector<8x32xbf16>, vector<32x64xbf16>, vector<8x64xf32> -> vector<8x64xf32>
    %c0_68 = arith.constant 0 : index
    %c0_69 = arith.constant 0 : index
    %c0_70 = arith.constant 0 : index
    %171 = vector.load %arg12[%c0_68, %c0_69, %c0_70] : memref<2x1x64xf32, #tpu.memory_space<vmem>>, vector<1x1x64xf32>
    %172 = vector.shape_cast %171 : vector<1x1x64xf32> to vector<1x64xf32>
    %173 = vector.broadcast %172 : vector<1x64xf32> to vector<8x64xf32>
    %174 = arith.addf %170, %173 : vector<8x64xf32>
    %cst_71 = arith.constant 5.000000e-01 : f32
    %175 = vector.broadcast %cst_71 : f32 to vector<8x64xf32>
    %176 = arith.mulf %175, %174 : vector<8x64xf32>
    %cst_72 = arith.constant 0.707106769 : f32
    %177 = vector.broadcast %cst_72 : f32 to vector<8x64xf32>
    %178 = arith.mulf %174, %177 : vector<8x64xf32>
    %179 = math.erf %178 : vector<8x64xf32>
    %cst_73 = arith.constant 1.000000e+00 : f32
    %180 = vector.broadcast %cst_73 : f32 to vector<8x64xf32>
    %181 = arith.addf %180, %179 : vector<8x64xf32>
    %182 = arith.mulf %176, %181 : vector<8x64xf32>
    %183 = arith.truncf %182 : vector<8x64xf32> to vector<8x64xbf16>
    %c0_74 = arith.constant 0 : index
    %c0_75 = arith.constant 0 : index
    %c0_76 = arith.constant 0 : index
    %184 = vector.load %arg13[%c0_74, %c0_75, %c0_76] : memref<2x64x32xbf16, #tpu.memory_space<vmem>>, vector<1x64x32xbf16>
    %185 = vector.shape_cast %184 : vector<1x64x32xbf16> to vector<64x32xbf16>
    %cst_77 = arith.constant dense<0.000000e+00> : vector<8x32xf32>
    %186 = tpu.matmul %183, %185, %cst_77 {dimension_numbers = #tpu.dot_dimension_numbers<[1], [0], [0], [1], [0, 0, 1, 1], [], []>} : vector<8x64xbf16>, vector<64x32xbf16>, vector<8x32xf32> -> vector<8x32xf32>
    %c0_78 = arith.constant 0 : index
    %c0_79 = arith.constant 0 : index
    %c0_80 = arith.constant 0 : index
    %187 = vector.load %arg14[%c0_78, %c0_79, %c0_80] : memref<2x1x32xf32, #tpu.memory_space<vmem>>, vector<1x1x32xf32>
    %188 = vector.shape_cast %187 : vector<1x1x32xf32> to vector<1x32xf32>
    %189 = vector.broadcast %188 : vector<1x32xf32> to vector<8x32xf32>
    %190 = arith.addf %186, %189 : vector<8x32xf32>
    %191 = arith.addf %140, %190 : vector<8x32xf32>
    %c1 = arith.constant 1 : index
    %c0_81 = arith.constant 0 : index
    %c0_82 = arith.constant 0 : index
    %192 = vector.load %arg3[%c1, %c0_81, %c0_82] : memref<2x1x32xf32, #tpu.memory_space<vmem>>, vector<1x1x32xf32>
    %193 = vector.shape_cast %192 : vector<1x1x32xf32> to vector<1x32xf32>
    %c1_83 = arith.constant 1 : index
    %c0_84 = arith.constant 0 : index
    %c0_85 = arith.constant 0 : index
    %194 = vector.load %arg4[%c1_83, %c0_84, %c0_85] : memref<2x1x32xf32, #tpu.memory_space<vmem>>, vector<1x1x32xf32>
    %195 = vector.shape_cast %194 : vector<1x1x32xf32> to vector<1x32xf32>
    %cst_86 = arith.constant dense<0.000000e+00> : vector<8xf32>
    %196 = vector.multi_reduction <add>, %191, %cst_86 [1] : vector<8x32xf32> to vector<8xf32>
    %197 = vector.shape_cast %196 : vector<8xf32> to vector<8x1xf32>
    %cst_87 = arith.constant 3.200000e+01 : f32
    %198 = vector.broadcast %cst_87 : f32 to vector<8x1xf32>
    %199 = arith.divf %197, %198 : vector<8x1xf32>
    %200 = vector.broadcast %199 : vector<8x1xf32> to vector<8x32xf32>
    %201 = arith.subf %191, %200 : vector<8x32xf32>
    %202 = arith.mulf %201, %201 : vector<8x32xf32>
    %cst_88 = arith.constant dense<0.000000e+00> : vector<8xf32>
    %203 = vector.multi_reduction <add>, %202, %cst_88 [1] : vector<8x32xf32> to vector<8xf32>
    %204 = vector.shape_cast %203 : vector<8xf32> to vector<8x1xf32>
    %cst_89 = arith.constant 3.200000e+01 : f32
    %205 = vector.broadcast %cst_89 : f32 to vector<8x1xf32>
    %206 = arith.divf %204, %205 : vector<8x1xf32>
    %207 = vector.broadcast %199 : vector<8x1xf32> to vector<8x32xf32>
    %208 = arith.subf %191, %207 : vector<8x32xf32>
    %cst_90 = arith.constant 9.99999997E-7 : f32
    %209 = vector.broadcast %cst_90 : f32 to vector<8x1xf32>
    %210 = arith.addf %206, %209 : vector<8x1xf32>
    %211 = math.rsqrt %210 : vector<8x1xf32>
    %212 = vector.broadcast %211 : vector<8x1xf32> to vector<8x32xf32>
    %213 = arith.mulf %208, %212 : vector<8x32xf32>
    %214 = vector.broadcast %193 : vector<1x32xf32> to vector<8x32xf32>
    %215 = arith.mulf %213, %214 : vector<8x32xf32>
    %216 = vector.broadcast %195 : vector<1x32xf32> to vector<8x32xf32>
    %217 = arith.addf %215, %216 : vector<8x32xf32>
    %218 = arith.truncf %217 : vector<8x32xf32> to vector<8x32xbf16>
    %c1_91 = arith.constant 1 : index
    %c0_92 = arith.constant 0 : index
    %c0_93 = arith.constant 0 : index
    %219 = vector.load %arg5[%c1_91, %c0_92, %c0_93] : memref<2x32x96xbf16, #tpu.memory_space<vmem>>, vector<1x32x96xbf16>
    %220 = vector.shape_cast %219 : vector<1x32x96xbf16> to vector<32x96xbf16>
    %cst_94 = arith.constant dense<0.000000e+00> : vector<8x96xf32>
    %221 = tpu.matmul %218, %220, %cst_94 {dimension_numbers = #tpu.dot_dimension_numbers<[1], [0], [0], [1], [0, 0, 1, 1], [], []>} : vector<8x32xbf16>, vector<32x96xbf16>, vector<8x96xf32> -> vector<8x96xf32>
    %c1_95 = arith.constant 1 : index
    %c0_96 = arith.constant 0 : index
    %c0_97 = arith.constant 0 : index
    %222 = vector.load %arg6[%c1_95, %c0_96, %c0_97] : memref<2x1x96xf32, #tpu.memory_space<vmem>>, vector<1x1x96xf32>
    %223 = vector.shape_cast %222 : vector<1x1x96xf32> to vector<1x96xf32>
    %224 = vector.broadcast %223 : vector<1x96xf32> to vector<8x96xf32>
    %225 = arith.addf %221, %224 : vector<8x96xf32>
    %c1_98 = arith.constant 1 : index
    %c0_99 = arith.constant 0 : index
    %c0_100 = arith.constant 0 : index
    %c0_101 = arith.constant 0 : index
    %226 = vector.load %arg7[%c1_98, %c0_99, %c0_100, %c0_101] : memref<2x4x8x32xbf16, #tpu.memory_space<vmem>>, vector<1x4x8x32xbf16>
    %227 = vector.shape_cast %226 : vector<1x4x8x32xbf16> to vector<4x8x32xbf16>
    %cst_102 = arith.constant 0.000000e+00 : f32
    %228 = vector.broadcast %cst_102 : f32 to vector<8x32xf32>
    %229 = vector.extract_strided_slice %225 {offsets = [0, 0], sizes = [8, 8], strides = [1, 1]} : vector<8x96xf32> to vector<8x8xf32>
    %230 = vector.extract_strided_slice %225 {offsets = [0, 32], sizes = [8, 8], strides = [1, 1]} : vector<8x96xf32> to vector<8x8xf32>
    %231 = vector.extract_strided_slice %225 {offsets = [0, 64], sizes = [8, 8], strides = [1, 1]} : vector<8x96xf32> to vector<8x8xf32>
    %232 = tpu.transpose %230, [1, 0] : vector<8x8xf32> -> vector<8x8xf32>
    %cst_103 = arith.constant dense<0.000000e+00> : vector<8x8xf32>
    %233 = tpu.matmul %229, %232, %cst_103 {dimension_numbers = #tpu.dot_dimension_numbers<[1], [0], [0], [1], [0, 0, 1, 1], [], []>} : vector<8x8xf32>, vector<8x8xf32>, vector<8x8xf32> -> vector<8x8xf32>
    %cst_104 = arith.constant 0.353553385 : f32
    %234 = vector.broadcast %cst_104 : f32 to vector<8x8xf32>
    %235 = arith.mulf %233, %234 : vector<8x8xf32>
    %236 = arith.addf %235, %2 : vector<8x8xf32>
    %cst_105 = arith.constant dense<0xFF800000> : vector<8xf32>
    %237 = vector.multi_reduction <maximumf>, %236, %cst_105 [1] : vector<8x8xf32> to vector<8xf32>
    %238 = vector.shape_cast %237 : vector<8xf32> to vector<8x1xf32>
    %239 = vector.broadcast %238 : vector<8x1xf32> to vector<8x8xf32>
    %240 = arith.subf %236, %239 : vector<8x8xf32>
    %241 = math.exp %240 : vector<8x8xf32>
    %cst_106 = arith.constant dense<0.000000e+00> : vector<8xf32>
    %242 = vector.multi_reduction <add>, %241, %cst_106 [1] : vector<8x8xf32> to vector<8xf32>
    %243 = vector.shape_cast %242 : vector<8xf32> to vector<8x1xf32>
    %244 = tpu.reciprocal %243 {approx = true} : vector<8x1xf32> -> vector<8x1xf32>
    %245 = vector.broadcast %244 : vector<8x1xf32> to vector<8x8xf32>
    %246 = arith.mulf %241, %245 : vector<8x8xf32>
    %cst_107 = arith.constant dense<0.000000e+00> : vector<8x8xf32>
    %247 = tpu.matmul %246, %231, %cst_107 {dimension_numbers = #tpu.dot_dimension_numbers<[1], [0], [0], [1], [0, 0, 1, 1], [], []>} : vector<8x8xf32>, vector<8x8xf32>, vector<8x8xf32> -> vector<8x8xf32>
    %248 = arith.truncf %247 : vector<8x8xf32> to vector<8x8xbf16>
    %249 = vector.extract_strided_slice %227 {offsets = [0, 0, 0], sizes = [1, 8, 32], strides = [1, 1, 1]} : vector<4x8x32xbf16> to vector<1x8x32xbf16>
    %250 = vector.shape_cast %249 : vector<1x8x32xbf16> to vector<8x32xbf16>
    %cst_108 = arith.constant dense<0.000000e+00> : vector<8x32xf32>
    %251 = tpu.matmul %248, %250, %cst_108 {dimension_numbers = #tpu.dot_dimension_numbers<[1], [0], [0], [1], [0, 0, 1, 1], [], []>} : vector<8x8xbf16>, vector<8x32xbf16>, vector<8x32xf32> -> vector<8x32xf32>
    %252 = arith.addf %228, %251 : vector<8x32xf32>
    %253 = vector.extract_strided_slice %225 {offsets = [0, 8], sizes = [8, 8], strides = [1, 1]} : vector<8x96xf32> to vector<8x8xf32>
    %254 = vector.extract_strided_slice %225 {offsets = [0, 40], sizes = [8, 8], strides = [1, 1]} : vector<8x96xf32> to vector<8x8xf32>
    %255 = vector.extract_strided_slice %225 {offsets = [0, 72], sizes = [8, 8], strides = [1, 1]} : vector<8x96xf32> to vector<8x8xf32>
    %256 = tpu.transpose %254, [1, 0] : vector<8x8xf32> -> vector<8x8xf32>
    %cst_109 = arith.constant dense<0.000000e+00> : vector<8x8xf32>
    %257 = tpu.matmul %253, %256, %cst_109 {dimension_numbers = #tpu.dot_dimension_numbers<[1], [0], [0], [1], [0, 0, 1, 1], [], []>} : vector<8x8xf32>, vector<8x8xf32>, vector<8x8xf32> -> vector<8x8xf32>
    %cst_110 = arith.constant 0.353553385 : f32
    %258 = vector.broadcast %cst_110 : f32 to vector<8x8xf32>
    %259 = arith.mulf %257, %258 : vector<8x8xf32>
    %260 = arith.addf %259, %2 : vector<8x8xf32>
    %cst_111 = arith.constant dense<0xFF800000> : vector<8xf32>
    %261 = vector.multi_reduction <maximumf>, %260, %cst_111 [1] : vector<8x8xf32> to vector<8xf32>
    %262 = vector.shape_cast %261 : vector<8xf32> to vector<8x1xf32>
    %263 = vector.broadcast %262 : vector<8x1xf32> to vector<8x8xf32>
    %264 = arith.subf %260, %263 : vector<8x8xf32>
    %265 = math.exp %264 : vector<8x8xf32>
    %cst_112 = arith.constant dense<0.000000e+00> : vector<8xf32>
    %266 = vector.multi_reduction <add>, %265, %cst_112 [1] : vector<8x8xf32> to vector<8xf32>
    %267 = vector.shape_cast %266 : vector<8xf32> to vector<8x1xf32>
    %268 = tpu.reciprocal %267 {approx = true} : vector<8x1xf32> -> vector<8x1xf32>
    %269 = vector.broadcast %268 : vector<8x1xf32> to vector<8x8xf32>
    %270 = arith.mulf %265, %269 : vector<8x8xf32>
    %cst_113 = arith.constant dense<0.000000e+00> : vector<8x8xf32>
    %271 = tpu.matmul %270, %255, %cst_113 {dimension_numbers = #tpu.dot_dimension_numbers<[1], [0], [0], [1], [0, 0, 1, 1], [], []>} : vector<8x8xf32>, vector<8x8xf32>, vector<8x8xf32> -> vector<8x8xf32>
    %272 = arith.truncf %271 : vector<8x8xf32> to vector<8x8xbf16>
    %273 = vector.extract_strided_slice %227 {offsets = [1, 0, 0], sizes = [1, 8, 32], strides = [1, 1, 1]} : vector<4x8x32xbf16> to vector<1x8x32xbf16>
    %274 = vector.shape_cast %273 : vector<1x8x32xbf16> to vector<8x32xbf16>
    %cst_114 = arith.constant dense<0.000000e+00> : vector<8x32xf32>
    %275 = tpu.matmul %272, %274, %cst_114 {dimension_numbers = #tpu.dot_dimension_numbers<[1], [0], [0], [1], [0, 0, 1, 1], [], []>} : vector<8x8xbf16>, vector<8x32xbf16>, vector<8x32xf32> -> vector<8x32xf32>
    %276 = arith.addf %252, %275 : vector<8x32xf32>
    %277 = vector.extract_strided_slice %225 {offsets = [0, 16], sizes = [8, 8], strides = [1, 1]} : vector<8x96xf32> to vector<8x8xf32>
    %278 = vector.extract_strided_slice %225 {offsets = [0, 48], sizes = [8, 8], strides = [1, 1]} : vector<8x96xf32> to vector<8x8xf32>
    %279 = vector.extract_strided_slice %225 {offsets = [0, 80], sizes = [8, 8], strides = [1, 1]} : vector<8x96xf32> to vector<8x8xf32>
    %280 = tpu.transpose %278, [1, 0] : vector<8x8xf32> -> vector<8x8xf32>
    %cst_115 = arith.constant dense<0.000000e+00> : vector<8x8xf32>
    %281 = tpu.matmul %277, %280, %cst_115 {dimension_numbers = #tpu.dot_dimension_numbers<[1], [0], [0], [1], [0, 0, 1, 1], [], []>} : vector<8x8xf32>, vector<8x8xf32>, vector<8x8xf32> -> vector<8x8xf32>
    %cst_116 = arith.constant 0.353553385 : f32
    %282 = vector.broadcast %cst_116 : f32 to vector<8x8xf32>
    %283 = arith.mulf %281, %282 : vector<8x8xf32>
    %284 = arith.addf %283, %2 : vector<8x8xf32>
    %cst_117 = arith.constant dense<0xFF800000> : vector<8xf32>
    %285 = vector.multi_reduction <maximumf>, %284, %cst_117 [1] : vector<8x8xf32> to vector<8xf32>
    %286 = vector.shape_cast %285 : vector<8xf32> to vector<8x1xf32>
    %287 = vector.broadcast %286 : vector<8x1xf32> to vector<8x8xf32>
    %288 = arith.subf %284, %287 : vector<8x8xf32>
    %289 = math.exp %288 : vector<8x8xf32>
    %cst_118 = arith.constant dense<0.000000e+00> : vector<8xf32>
    %290 = vector.multi_reduction <add>, %289, %cst_118 [1] : vector<8x8xf32> to vector<8xf32>
    %291 = vector.shape_cast %290 : vector<8xf32> to vector<8x1xf32>
    %292 = tpu.reciprocal %291 {approx = true} : vector<8x1xf32> -> vector<8x1xf32>
    %293 = vector.broadcast %292 : vector<8x1xf32> to vector<8x8xf32>
    %294 = arith.mulf %289, %293 : vector<8x8xf32>
    %cst_119 = arith.constant dense<0.000000e+00> : vector<8x8xf32>
    %295 = tpu.matmul %294, %279, %cst_119 {dimension_numbers = #tpu.dot_dimension_numbers<[1], [0], [0], [1], [0, 0, 1, 1], [], []>} : vector<8x8xf32>, vector<8x8xf32>, vector<8x8xf32> -> vector<8x8xf32>
    %296 = arith.truncf %295 : vector<8x8xf32> to vector<8x8xbf16>
    %297 = vector.extract_strided_slice %227 {offsets = [2, 0, 0], sizes = [1, 8, 32], strides = [1, 1, 1]} : vector<4x8x32xbf16> to vector<1x8x32xbf16>
    %298 = vector.shape_cast %297 : vector<1x8x32xbf16> to vector<8x32xbf16>
    %cst_120 = arith.constant dense<0.000000e+00> : vector<8x32xf32>
    %299 = tpu.matmul %296, %298, %cst_120 {dimension_numbers = #tpu.dot_dimension_numbers<[1], [0], [0], [1], [0, 0, 1, 1], [], []>} : vector<8x8xbf16>, vector<8x32xbf16>, vector<8x32xf32> -> vector<8x32xf32>
    %300 = arith.addf %276, %299 : vector<8x32xf32>
    %301 = vector.extract_strided_slice %225 {offsets = [0, 24], sizes = [8, 8], strides = [1, 1]} : vector<8x96xf32> to vector<8x8xf32>
    %302 = vector.extract_strided_slice %225 {offsets = [0, 56], sizes = [8, 8], strides = [1, 1]} : vector<8x96xf32> to vector<8x8xf32>
    %303 = vector.extract_strided_slice %225 {offsets = [0, 88], sizes = [8, 8], strides = [1, 1]} : vector<8x96xf32> to vector<8x8xf32>
    %304 = tpu.transpose %302, [1, 0] : vector<8x8xf32> -> vector<8x8xf32>
    %cst_121 = arith.constant dense<0.000000e+00> : vector<8x8xf32>
    %305 = tpu.matmul %301, %304, %cst_121 {dimension_numbers = #tpu.dot_dimension_numbers<[1], [0], [0], [1], [0, 0, 1, 1], [], []>} : vector<8x8xf32>, vector<8x8xf32>, vector<8x8xf32> -> vector<8x8xf32>
    %cst_122 = arith.constant 0.353553385 : f32
    %306 = vector.broadcast %cst_122 : f32 to vector<8x8xf32>
    %307 = arith.mulf %305, %306 : vector<8x8xf32>
    %308 = arith.addf %307, %2 : vector<8x8xf32>
    %cst_123 = arith.constant dense<0xFF800000> : vector<8xf32>
    %309 = vector.multi_reduction <maximumf>, %308, %cst_123 [1] : vector<8x8xf32> to vector<8xf32>
    %310 = vector.shape_cast %309 : vector<8xf32> to vector<8x1xf32>
    %311 = vector.broadcast %310 : vector<8x1xf32> to vector<8x8xf32>
    %312 = arith.subf %308, %311 : vector<8x8xf32>
    %313 = math.exp %312 : vector<8x8xf32>
    %cst_124 = arith.constant dense<0.000000e+00> : vector<8xf32>
    %314 = vector.multi_reduction <add>, %313, %cst_124 [1] : vector<8x8xf32> to vector<8xf32>
    %315 = vector.shape_cast %314 : vector<8xf32> to vector<8x1xf32>
    %316 = tpu.reciprocal %315 {approx = true} : vector<8x1xf32> -> vector<8x1xf32>
    %317 = vector.broadcast %316 : vector<8x1xf32> to vector<8x8xf32>
    %318 = arith.mulf %313, %317 : vector<8x8xf32>
    %cst_125 = arith.constant dense<0.000000e+00> : vector<8x8xf32>
    %319 = tpu.matmul %318, %303, %cst_125 {dimension_numbers = #tpu.dot_dimension_numbers<[1], [0], [0], [1], [0, 0, 1, 1], [], []>} : vector<8x8xf32>, vector<8x8xf32>, vector<8x8xf32> -> vector<8x8xf32>
    %320 = arith.truncf %319 : vector<8x8xf32> to vector<8x8xbf16>
    %321 = vector.extract_strided_slice %227 {offsets = [3, 0, 0], sizes = [1, 8, 32], strides = [1, 1, 1]} : vector<4x8x32xbf16> to vector<1x8x32xbf16>
    %322 = vector.shape_cast %321 : vector<1x8x32xbf16> to vector<8x32xbf16>
    %cst_126 = arith.constant dense<0.000000e+00> : vector<8x32xf32>
    %323 = tpu.matmul %320, %322, %cst_126 {dimension_numbers = #tpu.dot_dimension_numbers<[1], [0], [0], [1], [0, 0, 1, 1], [], []>} : vector<8x8xbf16>, vector<8x32xbf16>, vector<8x32xf32> -> vector<8x32xf32>
    %324 = arith.addf %300, %323 : vector<8x32xf32>
    %325 = arith.addf %191, %324 : vector<8x32xf32>
    %c1_127 = arith.constant 1 : index
    %c0_128 = arith.constant 0 : index
    %c0_129 = arith.constant 0 : index
    %326 = vector.load %arg8[%c1_127, %c0_128, %c0_129] : memref<2x1x32xf32, #tpu.memory_space<vmem>>, vector<1x1x32xf32>
    %327 = vector.shape_cast %326 : vector<1x1x32xf32> to vector<1x32xf32>
    %328 = vector.broadcast %327 : vector<1x32xf32> to vector<8x32xf32>
    %329 = arith.addf %325, %328 : vector<8x32xf32>
    %c1_130 = arith.constant 1 : index
    %c0_131 = arith.constant 0 : index
    %c0_132 = arith.constant 0 : index
    %330 = vector.load %arg9[%c1_130, %c0_131, %c0_132] : memref<2x1x32xf32, #tpu.memory_space<vmem>>, vector<1x1x32xf32>
    %331 = vector.shape_cast %330 : vector<1x1x32xf32> to vector<1x32xf32>
    %c1_133 = arith.constant 1 : index
    %c0_134 = arith.constant 0 : index
    %c0_135 = arith.constant 0 : index
    %332 = vector.load %arg10[%c1_133, %c0_134, %c0_135] : memref<2x1x32xf32, #tpu.memory_space<vmem>>, vector<1x1x32xf32>
    %333 = vector.shape_cast %332 : vector<1x1x32xf32> to vector<1x32xf32>
    %cst_136 = arith.constant dense<0.000000e+00> : vector<8xf32>
    %334 = vector.multi_reduction <add>, %329, %cst_136 [1] : vector<8x32xf32> to vector<8xf32>
    %335 = vector.shape_cast %334 : vector<8xf32> to vector<8x1xf32>
    %cst_137 = arith.constant 3.200000e+01 : f32
    %336 = vector.broadcast %cst_137 : f32 to vector<8x1xf32>
    %337 = arith.divf %335, %336 : vector<8x1xf32>
    %338 = vector.broadcast %337 : vector<8x1xf32> to vector<8x32xf32>
    %339 = arith.subf %329, %338 : vector<8x32xf32>
    %340 = arith.mulf %339, %339 : vector<8x32xf32>
    %cst_138 = arith.constant dense<0.000000e+00> : vector<8xf32>
    %341 = vector.multi_reduction <add>, %340, %cst_138 [1] : vector<8x32xf32> to vector<8xf32>
    %342 = vector.shape_cast %341 : vector<8xf32> to vector<8x1xf32>
    %cst_139 = arith.constant 3.200000e+01 : f32
    %343 = vector.broadcast %cst_139 : f32 to vector<8x1xf32>
    %344 = arith.divf %342, %343 : vector<8x1xf32>
    %345 = vector.broadcast %337 : vector<8x1xf32> to vector<8x32xf32>
    %346 = arith.subf %329, %345 : vector<8x32xf32>
    %cst_140 = arith.constant 9.99999997E-7 : f32
    %347 = vector.broadcast %cst_140 : f32 to vector<8x1xf32>
    %348 = arith.addf %344, %347 : vector<8x1xf32>
    %349 = math.rsqrt %348 : vector<8x1xf32>
    %350 = vector.broadcast %349 : vector<8x1xf32> to vector<8x32xf32>
    %351 = arith.mulf %346, %350 : vector<8x32xf32>
    %352 = vector.broadcast %331 : vector<1x32xf32> to vector<8x32xf32>
    %353 = arith.mulf %351, %352 : vector<8x32xf32>
    %354 = vector.broadcast %333 : vector<1x32xf32> to vector<8x32xf32>
    %355 = arith.addf %353, %354 : vector<8x32xf32>
    %356 = arith.truncf %355 : vector<8x32xf32> to vector<8x32xbf16>
    %c1_141 = arith.constant 1 : index
    %c0_142 = arith.constant 0 : index
    %c0_143 = arith.constant 0 : index
    %357 = vector.load %arg11[%c1_141, %c0_142, %c0_143] : memref<2x32x64xbf16, #tpu.memory_space<vmem>>, vector<1x32x64xbf16>
    %358 = vector.shape_cast %357 : vector<1x32x64xbf16> to vector<32x64xbf16>
    %cst_144 = arith.constant dense<0.000000e+00> : vector<8x64xf32>
    %359 = tpu.matmul %356, %358, %cst_144 {dimension_numbers = #tpu.dot_dimension_numbers<[1], [0], [0], [1], [0, 0, 1, 1], [], []>} : vector<8x32xbf16>, vector<32x64xbf16>, vector<8x64xf32> -> vector<8x64xf32>
    %c1_145 = arith.constant 1 : index
    %c0_146 = arith.constant 0 : index
    %c0_147 = arith.constant 0 : index
    %360 = vector.load %arg12[%c1_145, %c0_146, %c0_147] : memref<2x1x64xf32, #tpu.memory_space<vmem>>, vector<1x1x64xf32>
    %361 = vector.shape_cast %360 : vector<1x1x64xf32> to vector<1x64xf32>
    %362 = vector.broadcast %361 : vector<1x64xf32> to vector<8x64xf32>
    %363 = arith.addf %359, %362 : vector<8x64xf32>
    %cst_148 = arith.constant 5.000000e-01 : f32
    %364 = vector.broadcast %cst_148 : f32 to vector<8x64xf32>
    %365 = arith.mulf %364, %363 : vector<8x64xf32>
    %cst_149 = arith.constant 0.707106769 : f32
    %366 = vector.broadcast %cst_149 : f32 to vector<8x64xf32>
    %367 = arith.mulf %363, %366 : vector<8x64xf32>
    %368 = math.erf %367 : vector<8x64xf32>
    %cst_150 = arith.constant 1.000000e+00 : f32
    %369 = vector.broadcast %cst_150 : f32 to vector<8x64xf32>
    %370 = arith.addf %369, %368 : vector<8x64xf32>
    %371 = arith.mulf %365, %370 : vector<8x64xf32>
    %372 = arith.truncf %371 : vector<8x64xf32> to vector<8x64xbf16>
    %c1_151 = arith.constant 1 : index
    %c0_152 = arith.constant 0 : index
    %c0_153 = arith.constant 0 : index
    %373 = vector.load %arg13[%c1_151, %c0_152, %c0_153] : memref<2x64x32xbf16, #tpu.memory_space<vmem>>, vector<1x64x32xbf16>
    %374 = vector.shape_cast %373 : vector<1x64x32xbf16> to vector<64x32xbf16>
    %cst_154 = arith.constant dense<0.000000e+00> : vector<8x32xf32>
    %375 = tpu.matmul %372, %374, %cst_154 {dimension_numbers = #tpu.dot_dimension_numbers<[1], [0], [0], [1], [0, 0, 1, 1], [], []>} : vector<8x64xbf16>, vector<64x32xbf16>, vector<8x32xf32> -> vector<8x32xf32>
    %c1_155 = arith.constant 1 : index
    %c0_156 = arith.constant 0 : index
    %c0_157 = arith.constant 0 : index
    %376 = vector.load %arg14[%c1_155, %c0_156, %c0_157] : memref<2x1x32xf32, #tpu.memory_space<vmem>>, vector<1x1x32xf32>
    %377 = vector.shape_cast %376 : vector<1x1x32xf32> to vector<1x32xf32>
    %378 = vector.broadcast %377 : vector<1x32xf32> to vector<8x32xf32>
    %379 = arith.addf %375, %378 : vector<8x32xf32>
    %380 = arith.addf %329, %379 : vector<8x32xf32>
    %c0_158 = arith.constant 0 : index
    %c0_159 = arith.constant 0 : index
    %381 = vector.load %arg15[%c0_158, %c0_159] : memref<1x32xf32, #tpu.memory_space<vmem>>, vector<1x32xf32>
    %c0_160 = arith.constant 0 : index
    %c0_161 = arith.constant 0 : index
    %382 = vector.load %arg16[%c0_160, %c0_161] : memref<1x32xf32, #tpu.memory_space<vmem>>, vector<1x32xf32>
    %cst_162 = arith.constant dense<0.000000e+00> : vector<8xf32>
    %383 = vector.multi_reduction <add>, %380, %cst_162 [1] : vector<8x32xf32> to vector<8xf32>
    %384 = vector.shape_cast %383 : vector<8xf32> to vector<8x1xf32>
    %cst_163 = arith.constant 3.200000e+01 : f32
    %385 = vector.broadcast %cst_163 : f32 to vector<8x1xf32>
    %386 = arith.divf %384, %385 : vector<8x1xf32>
    %387 = vector.broadcast %386 : vector<8x1xf32> to vector<8x32xf32>
    %388 = arith.subf %380, %387 : vector<8x32xf32>
    %389 = arith.mulf %388, %388 : vector<8x32xf32>
    %cst_164 = arith.constant dense<0.000000e+00> : vector<8xf32>
    %390 = vector.multi_reduction <add>, %389, %cst_164 [1] : vector<8x32xf32> to vector<8xf32>
    %391 = vector.shape_cast %390 : vector<8xf32> to vector<8x1xf32>
    %cst_165 = arith.constant 3.200000e+01 : f32
    %392 = vector.broadcast %cst_165 : f32 to vector<8x1xf32>
    %393 = arith.divf %391, %392 : vector<8x1xf32>
    %394 = vector.broadcast %386 : vector<8x1xf32> to vector<8x32xf32>
    %395 = arith.subf %380, %394 : vector<8x32xf32>
    %cst_166 = arith.constant 9.99999997E-7 : f32
    %396 = vector.broadcast %cst_166 : f32 to vector<8x1xf32>
    %397 = arith.addf %393, %396 : vector<8x1xf32>
    %398 = math.rsqrt %397 : vector<8x1xf32>
    %399 = vector.broadcast %398 : vector<8x1xf32> to vector<8x32xf32>
    %400 = arith.mulf %395, %399 : vector<8x32xf32>
    %401 = vector.broadcast %381 : vector<1x32xf32> to vector<8x32xf32>
    %402 = arith.mulf %400, %401 : vector<8x32xf32>
    %403 = vector.broadcast %382 : vector<1x32xf32> to vector<8x32xf32>
    %404 = arith.addf %402, %403 : vector<8x32xf32>
    %c0_167 = arith.constant 0 : index
    %c0_168 = arith.constant 0 : index
    %c0_169 = arith.constant 0 : index
    %405 = vector.load %arg17[%c0_167, %c0_168, %c0_169] : memref<1x8x32xf32, #tpu.memory_space<vmem>>, vector<1x8x32xf32>
    %406 = vector.shape_cast %405 : vector<1x8x32xf32> to vector<8x32xf32>
    %407 = vector.shape_cast %404 : vector<8x32xf32> to vector<1x8x32xf32>
    tpu.vector_store %arg17[%c0_167, %c0_168, %c0_169], %407 {strides = array<i32>} : memref<1x8x32xf32, #tpu.memory_space<vmem>>, vector<1x8x32xf32>,
    return
  }
  func.func @transform_0(%arg0: i32) -> (i32, i32, i32) {
    %c0_i32 = arith.constant 0 : i32
    %c0_i32_0 = arith.constant 0 : i32
    %c0_i32_1 = arith.constant 0 : i32
    return %arg0, %c0_i32, %c0_i32_0 : i32, i32, i32
  }
  func.func @transform_1(%arg0: i32) -> (i32, i32) {
    %c0_i32 = arith.constant 0 : i32
    %c0_i32_0 = arith.constant 0 : i32
    %c0_i32_1 = arith.constant 0 : i32
    return %c0_i32, %c0_i32_0 : i32, i32
  }
  func.func @transform_2(%arg0: i32) -> (i32, i32, i32) {
    %c0_i32 = arith.constant 0 : i32
    %c0_i32_0 = arith.constant 0 : i32
    %c0_i32_1 = arith.constant 0 : i32
    %c0_i32_2 = arith.constant 0 : i32
    return %c0_i32, %c0_i32_0, %c0_i32_1 : i32, i32, i32
  }
  func.func @transform_3(%arg0: i32) -> (i32, i32, i32) {
    %c0_i32 = arith.constant 0 : i32
    %c0_i32_0 = arith.constant 0 : i32
    %c0_i32_1 = arith.constant 0 : i32
    %c0_i32_2 = arith.constant 0 : i32
    return %c0_i32, %c0_i32_0, %c0_i32_1 : i32, i32, i32
  }
  func.func @transform_4(%arg0: i32) -> (i32, i32, i32) {
    %c0_i32 = arith.constant 0 : i32
    %c0_i32_0 = arith.constant 0 : i32
    %c0_i32_1 = arith.constant 0 : i32
    %c0_i32_2 = arith.constant 0 : i32
    return %c0_i32, %c0_i32_0, %c0_i32_1 : i32, i32, i32
  }
  func.func @transform_5(%arg0: i32) -> (i32, i32, i32) {
    %c0_i32 = arith.constant 0 : i32
    %c0_i32_0 = arith.constant 0 : i32
    %c0_i32_1 = arith.constant 0 : i32
    %c0_i32_2 = arith.constant 0 : i32
    return %c0_i32, %c0_i32_0, %c0_i32_1 : i32, i32, i32
  }
  func.func @transform_6(%arg0: i32) -> (i32, i32, i32, i32) {
    %c0_i32 = arith.constant 0 : i32
    %c0_i32_0 = arith.constant 0 : i32
    %c0_i32_1 = arith.constant 0 : i32
    %c0_i32_2 = arith.constant 0 : i32
    %c0_i32_3 = arith.constant 0 : i32
    return %c0_i32, %c0_i32_0, %c0_i32_1, %c0_i32_2 : i32, i32, i32, i32
  }
  func.func @transform_7(%arg0: i32) -> (i32, i32, i32) {
    %c0_i32 = arith.constant 0 : i32
    %c0_i32_0 = arith.constant 0 : i32
    %c0_i32_1 = arith.constant 0 : i32
    %c0_i32_2 = arith.constant 0 : i32
    return %c0_i32, %c0_i32_0, %c0_i32_1 : i32, i32, i32
  }
  func.func @transform_8(%arg0: i32) -> (i32, i32, i32) {
    %c0_i32 = arith.constant 0 : i32
    %c0_i32_0 = arith.constant 0 : i32
    %c0_i32_1 = arith.constant 0 : i32
    %c0_i32_2 = arith.constant 0 : i32
    return %c0_i32, %c0_i32_0, %c0_i32_1 : i32, i32, i32
  }
  func.func @transform_9(%arg0: i32) -> (i32, i32, i32) {
    %c0_i32 = arith.constant 0 : i32
    %c0_i32_0 = arith.constant 0 : i32
    %c0_i32_1 = arith.constant 0 : i32
    %c0_i32_2 = arith.constant 0 : i32
    return %c0_i32, %c0_i32_0, %c0_i32_1 : i32, i32, i32
  }
  func.func @transform_10(%arg0: i32) -> (i32, i32, i32) {
    %c0_i32 = arith.constant 0 : i32
    %c0_i32_0 = arith.constant 0 : i32
    %c0_i32_1 = arith.constant 0 : i32
    %c0_i32_2 = arith.constant 0 : i32
    return %c0_i32, %c0_i32_0, %c0_i32_1 : i32, i32, i32
  }
  func.func @transform_11(%arg0: i32) -> (i32, i32, i32) {
    %c0_i32 = arith.constant 0 : i32
    %c0_i32_0 = arith.constant 0 : i32
    %c0_i32_1 = arith.constant 0 : i32
    %c0_i32_2 = arith.constant 0 : i32
    return %c0_i32, %c0_i32_0, %c0_i32_1 : i32, i32, i32
  }
  func.func @transform_12(%arg0: i32) -> (i32, i32, i32) {
    %c0_i32 = arith.constant 0 : i32
    %c0_i32_0 = arith.constant 0 : i32
    %c0_i32_1 = arith.constant 0 : i32
    %c0_i32_2 = arith.constant 0 : i32
    return %c0_i32, %c0_i32_0, %c0_i32_1 : i32, i32, i32
  }
  func.func @transform_13(%arg0: i32) -> (i32, i32, i32) {
    %c0_i32 = arith.constant 0 : i32
    %c0_i32_0 = arith.constant 0 : i32
    %c0_i32_1 = arith.constant 0 : i32
    %c0_i32_2 = arith.constant 0 : i32
    return %c0_i32, %c0_i32_0, %c0_i32_1 : i32, i32, i32
  }
  func.func @transform_14(%arg0: i32) -> (i32, i32) {
    %c0_i32 = arith.constant 0 : i32
    %c0_i32_0 = arith.constant 0 : i32
    %c0_i32_1 = arith.constant 0 : i32
    return %c0_i32, %c0_i32_0 : i32, i32
  }
  func.func @transform_15(%arg0: i32) -> (i32, i32) {
    %c0_i32 = arith.constant 0 : i32
    %c0_i32_0 = arith.constant 0 : i32
    %c0_i32_1 = arith.constant 0 : i32
    return %c0_i32, %c0_i32_0 : i32, i32
  }
  func.func @transform_16(%arg0: i32) -> (i32, i32, i32) {
    %c0_i32 = arith.constant 0 : i32
    %c0_i32_0 = arith.constant 0 : i32
    %c0_i32_1 = arith.constant 0 : i32
    return %arg0, %c0_i32, %c0_i32_0 : i32, i32, i32
  }
}

</mosaic_0001>

<bundles_post_ra>
// kernel: tpu_custom_call.1
= control target key start
LH: loop header
LB: loop body
LE: loop exit
PB: predicated region body
PF: predicated region fallthrough
CT: control target
= control target key end

     0   :  { %s4383_s0 = inlined_call_operand.hbm [shape: f32[2,8,32], index: 0, kind: input, shape index: {}]   ;;  %s4384_s1 = inlined_call_operand.hbm [shape: f32[8,8], index: 1, kind: input, shape index: {}]   ;;  %s4385_s2 = inlined_call_operand.vmem [shape: f32[2,1,32], index: 2, kind: input, shape index: {}]   ;;  %s4386_s3 = inlined_call_operand.vmem [shape: f32[2,1,32], index: 3, kind: input, shape index: {}]   ;;  %s4387_s4 = inlined_call_operand.vmem [shape: bf16[2,32,96], index: 4, kind: input, shape index: {}]   ;;  %s4388_s5 = inlined_call_operand.vmem [shape: f32[2,1,96], index: 5, kind: input, shape index: {}]   ;;  %s4389_s6 = inlined_call_operand.vmem [shape: bf16[2,4,8,32], index: 6, kind: input, shape index: {}]   ;;  %s4390_s7 = inlined_call_operand.vmem [shape: f32[2,1,32], index: 7, kind: input, shape index: {}]   ;;  %s4391_s8 = inlined_call_operand.vmem [shape: f32[2,1,32], index: 8, kind: input, shape index: {}]   ;;  %s4392_s9 = inlined_call_operand.vmem [shape: f32[2,1,32], index: 9, kind: input, shape index: {}]   ;;  %s4393_s10 = inlined_call_operand.vmem [shape: bf16[2,32,64], index: 10, kind: input, shape index: {}]   ;;  %s4394_s11 = inlined_call_operand.hbm [shape: f32[2,1,64], index: 11, kind: input, shape index: {}]   ;;  %s4395_s12 = inlined_call_operand.vmem [shape: bf16[2,64,32], index: 12, kind: input, shape index: {}]   ;;  %s4396_s13 = inlined_call_operand.vmem [shape: f32[2,1,32], index: 13, kind: input, shape index: {}]   ;;  %s4397_s14 = inlined_call_operand.vmem [shape: f32[1,32], index: 14, kind: input, shape index: {}]   ;;  %s4398_s15 = inlined_call_operand.vmem [shape: f32[1,32], index: 15, kind: input, shape index: {}]   ;;  %s4399_s16 = inlined_call_operand.hbm [shape: f32[2,8,32], index: 16, kind: output, shape index: {}]  }
   0x1   :  { %4414 = sst [smem:[#allocation15_spill]] %s4383_s0 }
   0x2   :  { %4415 = sst [smem:[#allocation16_spill]] %s4384_s1 }
   0x3   :  { %4416 = sst [smem:[#allocation17_spill]] %s4385_s2 }
   0x4   :  { %4417 = sst [smem:[#allocation18_spill]] %s4386_s3 }
   0x5   :  { %4418 = sst [smem:[#allocation19_spill]] %s4394_s11 }
   0x6   :  { %4419 = sst [smem:[#allocation20_spill]] %s4397_s14 }
   0x7   :  { %4420 = sst [smem:[#allocation21_spill]] %s4398_s15 }
   0x8   :  { %4421 = sst [smem:[#allocation22_spill]] %s4399_s16 }
   0x9   :  { %21 = vsyncpa [#allocation3], 0 }
   0xa   :  { %23 = vsyncpa [#allocation3 + $0x1], 0 }
   0xb   :  { %24 = vsyncpa [#allocation6], 0 }
   0xc   :  { %25 = vsyncpa [#allocation4], 0 }
   0xd   :  { %27 = vsyncpa [#allocation4 + $0x1], 0  ;;  %s3794_s21 = smov 0   ;;  %s3796_s22 = smov 0  }
   0xe   :  { %s3798_s23 = smov 0   ;;  %s3800_s24 = smov 0  }
   0xf LB: > { %4422 = sst [smem:[#allocation12_spill]] %s3676_s21  ;;  %s3815_s25 = sadd.s32 4294967295, %s3688_s24   ;;  %s3688_s24 = sphi %s3800_s24, %s4459_s24   ;;  %s3684_s23 = sphi %s3798_s23, %s4458_s23   ;;  %s3680_s22 = sphi %s3796_s22, %s4457_s22   ;;  %s3676_s21 = sphi %s3794_s21, %s4456_s21  }
  0x10   : > { %s3019_s26 = sadd.s32 4294967294, %s3688_s24   ;;  %p53_p0 = scmp.ne.s32.totalorder %s3680_s22, %s3676_s21 }
  0x11   : > { %p4404_p1 = scmp.eq.s32.totalorder %s3815_s25, 0  ;;  %p398_p3 = scmp.eq.s32.totalorder %s3019_s26, 1 }
  0x12   : > { %p3020_p5 = scmp.ge.s32.totalorder %s3688_s24, 1  ;;  %p405_p7 = scmp.lt.s32.totalorder %s3688_s24, 3 }
  0x13   : > { %p3824_p4 = por %p4404_p1, %p53_p0  ;;  %p3829_p6 = por %p398_p3, %p53_p0 }
  0x14   : > { %p3834_p8 = pnand %p3020_p5, %p405_p7  ;;  %s3690_s30 = smov [#allocation5]  }
  0x15   : > { %s4423_s27 = scalar_select %p3824_p4, 1, 0 }
  0x16   : > { %s4424_s28 = scalar_select %p3829_p6, 1, 0 }
  0x17   : > { %s4426_s29 = scalar_select %p3834_p8, 1, 0 }
  0x18   : > { %4425 = sst [smem:[#allocation13_spill]] %s4424_s28  ;;  %s418_s0 = sshll.u32 %s3690_s30, 4  ;;  %s419_s0 = int_to_ptr.vmem [resolvable:$true] %s418_s0 }
  0x19   : > { %p3400_p10 = pneg %p3834_p8  ;;  %s3691_s17 = smov [#allocation7]  }
  0x1a   : > { %s455_s18 = sshll.u32 %s3691_s17, 4  ;;  %s4428_s1 = sld [smem:[#allocation16_spill]]  ;;  %s3847_s18 = int_to_ptr.vmem [resolvable:$true] %s455_s18 }
  0x1b   : > { %p3843_p11 = pnand %p3400_p10, %p4404_p1 }
  0x1d   : > { %p3534_p13 = pneg %p3843_p11 }
  0x20   : > { %s3532_s28 = scalar_lea.hbm %s4428_s1, 128 }
  0x21   : > { %p3533_p12 = scmp.ne.s32.totalorder %s4428_s1, %s3532_s28  ;;  %p3539_p5 = scmp.lt.u32.totalorder %s3532_s28, %s4428_s1 }
  0x23   : > { %p3535_p0 = pnand %p3534_p13, %p3533_p12 }
  0x25   : > { %p3536_p3 = pneg %p3535_p0 }
  0x27   : > { %p3541_p7 = pnand %p3539_p5, %p3536_p3 }
  0x29   : > { %3544 = shalt.err (!%p3541_p7)
}
  0x2a   : > { %s3545_s15 = scalar_lea.vmem %s419_s0, 128  ;;  %p3553_p2 = scmp.lt.s32.totalorder %s419_s0, %s419_s0 }
  0x2b   : > { %p3546_p10 = scmp.ne.s32.totalorder %s419_s0, %s3545_s15  ;;  %p3554_p6 = scmp.lt.s32.totalorder %s3545_s15, %s3545_s15 }
  0x2d   : > { %p3548_p9 = pnand %p3546_p10, %p3534_p13  ;;  %p3555_p4 = por %p3554_p6, %p3553_p2 }
  0x2f   : > { %p3549_p1 = pneg %p3548_p9 }
  0x31   : > { %p3556_p8 = pnand %p3555_p4, %p3549_p1 }
  0x33   : > { %3559 = shalt.err (!%p3556_p8)
}
  0x34   : > { %3403 = dma.hbm_to_vmem [thread:$0]  (!%p3843_p11), %s4428_s1, 128, %s419_s0, [#allocation6]  }
  0x35   : > { %s4429_s11 = sld [smem:[#allocation19_spill]] }
  0x3b   : > { %s3560_s26 = scalar_lea.hbm %s4429_s11, 32 }
  0x3c   : > { %p3561_p9 = scmp.ne.s32.totalorder %s4429_s11, %s3560_s26  ;;  %p3567_p4 = scmp.lt.u32.totalorder %s3560_s26, %s4429_s11 }
  0x3e   : > { %p3563_p2 = pnand %p3561_p9, %p3534_p13 }
  0x40   : > { %p3564_p1 = pneg %p3563_p2 }
  0x42   : > { %p3569_p6 = pnand %p3567_p4, %p3564_p1 }
  0x44   : > { %3572 = shalt.err (!%p3569_p6)
}
  0x45   : > { %s3573_s0 = scalar_lea.vmem %s3847_s18, 32  ;;  %p3581_p3 = scmp.lt.s32.totalorder %s3847_s18, %s3847_s18 }
  0x46   : > { %p3574_p8 = scmp.ne.s32.totalorder %s3847_s18, %s3573_s0  ;;  %p3582_p5 = scmp.lt.s32.totalorder %s3573_s0, %s3573_s0 }
  0x48   : > { %p3576_p12 = pnand %p3574_p8, %p3534_p13  ;;  %p3583_p7 = por %p3582_p5, %p3581_p3 }
  0x4a   : > { %p3577_p0 = pneg %p3576_p12 }
  0x4c   : > { %p3584_p10 = pnand %p3583_p7, %p3577_p0 }
  0x4e   : > { %3587 = shalt.err (!%p3584_p10)
}
  0x4f   : > { %s3692_s14 = smov 16   ;;  %s3693_s21 = smov 1  }
  0x50   : > { %3406 = dma.hbm_to_vmem [thread:$0]  (!%p3843_p11), %s4429_s11, 32, %s3847_s18, [#allocation6], %s3692_s14, %s3692_s14, %s3693_s21  }
  0x51   : > { %s3897_s28 = sadd.s32 1, %s3688_s24   ;;  %s40_s26 = sadd.s32 1, %s3684_s23 }
  0x52   : > { %s37_s30 = ssub.s32 %s3688_s24, %s3897_s28  ;;  %p47_p13 = scmp.ne.s32.totalorder %s3684_s23, %s3680_s22 }
  0x53   : > { %p38_p9 = scmp.eq.s32.totalorder %s37_s30, 0  ;;  %p48_p2 = scmp.eq.s32.totalorder %s3688_s24, 0 }
  0x54   : > { %p4430_p1 = scmp.eq.s32.totalorder %s3815_s25, 1  ;;  %p3417_p6 = scmp.lt.s32.totalorder %s3688_s24, 2 }
  0x55   : > { %s3913_s15 = scalar_select %p38_p9, %s3684_s23, %s40_s26  }
  0x56   : > { %p3907_p4 = por %p4430_p1, %p47_p13  ;;  %p49_p8 = por %p48_p2, %p47_p13 }
  0x57   : > { %4432 = sst [smem:[#allocation14_spill]] %s3913_s15  ;;  %s481_s19 = sand.u32 1, %s3684_s23  }
  0x58   : > { %s3024_s0 = sshll.u32 %s481_s19, 3  ;;  %s3025_s18 = sshll.u32 %s3688_s24, 7 }
  0x59   : > { %s4433_s20 = sld [smem:[#allocation15_spill]]  ;;  %s485_s30 = scalar_lea.vmem [#allocation2], %s3024_s0 }
  0x5a   : > { %s492_s1 = sshll.u32 %s485_s30, 4  ;;  %p3924_p11 = pnand %p3417_p6, %p49_p8  ;;  %s3922_s1 = int_to_ptr.vmem [resolvable:$true] %s492_s1 }
  0x5b   : > { %s482_s11 = scalar_lea.sflag [#allocation3], %s481_s19 }
  0x5c   : > { %p3590_p0 = pneg %p3924_p11 }
  0x5f   : > { %s3920_s16 = scalar_lea.hbm %s4433_s20, %s3025_s18  ;;  %s3593_s14 = scalar_lea.hbm %s4433_s20, 256 }
  0x60   : > { %s3588_s15 = scalar_lea.hbm %s3920_s16, 128  ;;  %p3594_p7 = scmp.lt.u32.totalorder %s3920_s16, %s4433_s20 }
  0x61   : > { %p3589_p12 = scmp.ne.s32.totalorder %s3920_s16, %s3588_s15  ;;  %p3595_p10 = scmp.lt.u32.totalorder %s3593_s14, %s3588_s15 }
  0x62   : > { %p3597_p9 = scmp.lt.u32.totalorder %s3588_s15, %s3920_s16 }
  0x63   : > { %p3591_p3 = pnand %p3590_p0, %p3589_p12  ;;  %p3596_p13 = por %p3595_p10, %p3594_p7 }
  0x65   : > { %p3592_p5 = pneg %p3591_p3  ;;  %p3598_p2 = por %p3597_p9, %p3596_p13 }
  0x67   : > { %p3599_p1 = pnand %p3598_p2, %p3592_p5 }
  0x69   : > { %3602 = shalt.err (!%p3599_p1)
}
  0x6a   : > { %s3603_s19 = scalar_lea.vmem %s3922_s1, 128  ;;  %s3694_s18 = smov [#allocation2]  }
  0x6b   : > { %p3604_p6 = scmp.ne.s32.totalorder %s3922_s1, %s3603_s19  ;;  %s3608_s0 = sshll.u32 %s3694_s18, 4  ;;  %s3609_s0 = int_to_ptr.vmem [resolvable:$false] %s3608_s0 }
  0x6c   : > { %s3610_s21 = scalar_lea.vmem %s3609_s0, 256  ;;  %p3611_p3 = scmp.lt.s32.totalorder %s3922_s1, %s3609_s0 }
  0x6d   : > { %p3606_p8 = pnand %p3604_p6, %p3590_p0  ;;  %p3612_p7 = scmp.lt.s32.totalorder %s3610_s21, %s3603_s19 }
  0x6f   : > { %p3607_p12 = pneg %p3606_p8  ;;  %p3613_p10 = por %p3612_p7, %p3611_p3 }
  0x71   : > { %p3614_p13 = pnand %p3613_p10, %p3607_p12 }
  0x73   : > { %3617 = shalt.err (!%p3614_p13)
}
  0x74   : > { %3410 = dma.hbm_to_vmem [thread:$0]  (!%p3924_p11), %s3920_s16, 128, %s3922_s1, %s482_s11  }
  0x75   : > { %p4435_p5 = scmp.ne.s32.totalorder %s4426_s29, 0 }
  0x76   : > { %s3956_s15 = sand.u32 (!%p4435_p5), 1, %s3680_s22   ;;  %p4436_p0 = scmp.ne.s32.totalorder (!%p4435_p5), %s4423_s27, 0 }
  0x77   : > { %501 = sbr.rel (%p4435_p5) target bundleno = 8314 (0x207a), region = 84  ;;  %s4407_s14 = sshll.u32 (!%p4435_p5), %s3956_s15, 3 }
  0x78   : > { %s504_s30 = scalar_lea.sflag (!%p4435_p5), [#allocation3], %s3956_s15  ;;  %s507_s19 = scalar_lea.vmem (!%p4435_p5), [#allocation2], %s4407_s14 }
  0x7e   : > { %3663 = dma.done.wait (%p4436_p0), %s504_s30, 128  }
  0x7f   : > { %3665 = vsyncadd (%p4436_p0), %s504_s30, 4294967168  ;;  %p4437_p11 = scmp.eq.s32.totalorder %s3815_s25, 0 }
  0x81   : > { %3667 = dma.done.wait (%p4437_p11), [#allocation6], 160   ;;  %p4438_p9 = pmov %p4437_p11 }
  0x82   : > { %vm569_vm0 = vcmask 261120   ;;  %v3970_v0 = vld [vmem:[%s507_s19] sm:$0xff]  ;;  %v3695_v8 = vmov 0.0   ;;  %vm3696_vm1 = vmmov 0   ;;  %s4439_s2 = sld [smem:[#allocation17_spill]]  ;;  %s4440_s3 = sld [smem:[#allocation18_spill]] }
  0x83   : > { %3669 = vsyncadd (%p4438_p9), [#allocation6], 4294967136  ;;  %v570_v1 = vsel %vm569_vm0, %v3970_v0, 0.0  ;;  %v3470_v7 = vld [vmem:[%s4387_s4] sm:$0xff]   ;;  %3204 = vmatprep.subr.bf16.mxu0 %v3695_v8  ;;  %3208 = vmatprep.mubr.msk.bf16.mxu0 %vm3696_vm1, %v3695_v8  ;;  %v3471_v9 = vld [vmem:[%s4387_s4 + $0x8] sm:$0xff]   ;;  %s4408_s19 = smov 64  }
  0x84   : > { %571 = vadd.xlane.f32.xlu0 %v570_v1  ;;  %3205 = vmatpush3.bf16.msra.mxu0 %v3470_v7  ;;  %v3033_v20 = vld [vmem:[%s4388_s5] ss:$0 sm:$0xff]  ;;  %s3698_s1 = smov 96   ;;  %s3699_s11 = smov 88   ;;  %vm672_vm2 = vcmask 64512   ;;  %v4017_v29 = vld [vmem:[#allocation5] sm:$0xff] }
  0x85   : > { %3212 = vmatprep.subr.mxu1 %v3695_v8  ;;  %3206 = vmatprep.subr.bf16.mxu0 %v3695_v8  ;;  %s3700_s27 = smov 120   ;;  %s3701_s29 = smov 56   ;;  %vm1008_vm3 = vcmask 1043456   ;;  %v666_v57 = vld [vmem:[%s4389_s6 + $0x4] sm:$0xf]  ;;  %vm1678_vm4 = vcmask 523264  }
  0x86   : > { %3214 = vmatprep.mubr.msk.f32.mxu1 %vm3696_vm1, %v3695_v8  ;;  %s3702_s16 = smov 80   ;;  %s4413_s26 = smov 112   ;;  %v1010_v58 = vsel %vm1008_vm3, %v666_v57, 0  ;;  %v665_v60 = vld [vmem:[%s4389_s6] sm:$0xf] }
  0x87   : > { %s4412_s18 = smov 48   ;;  %s4410_s0 = smov 72   ;;  %v1056_v63 = vsel %vm1008_vm3, %v665_v60, 0 }
  0x88   : > { %3207 = vmatpush3.bf16.msra.mxu0 %v3471_v9  ;;  %v3031_v14 = vld [vmem:[%s4439_s2] ss:$0 sm:$0xff]  ;;  %s4411_s14 = smov 104   ;;  %s4409_s30 = smov 40  }
  0x89   : > { %3227 = vmatprep.subr.mxu0 %v3695_v8  ;;  %v3032_v16 = vld [vmem:[%s4440_s3] ss:$0 sm:$0xff]  ;;  %s4449_s21 = sshll.u32 %s3956_s15, 3 }
 0x111   : > { %v572_v2 = vpop.xlane.xlu0 %571 }
 0x112   : > { %v574_v3 = vmul.f32 0.03125, %v572_v2 }
 0x114   : > { %v575_v4 = vsub.f32 %v3970_v0, %v574_v3 }
 0x116   : > { %v576_v5 = vmul.f32 %v575_v4, %v575_v4 }
 0x118   : > { %v577_v6 = vsel %vm569_vm0, %v576_v5, 0.0 }
 0x119   : > { %578 = vadd.xlane.f32.xlu0 %v577_v6 }
 0x1a6   : > { %v579_v10 = vpop.xlane.xlu0 %578 }
 0x1a7   : > { %v580_v11 = vmul.f32 0.03125, %v579_v10 }
 0x1a9   : > { %v581_v12 = vadd.f32 1e-06, %v580_v11 }
 0x1ab   : > { %3486 = vrsqrt.f32 %v581_v12 }
 0x1b5   : > { %v3487_v13 = vpop.eup %3486 }
 0x1b6   : > { %v583_v15 = vmul.f32 %v3487_v13, %v575_v4 }
 0x1b8   : > { %v590_v17 = vmul.f32 %v3031_v14, %v583_v15 }
 0x1ba   : > { %v597_v18 = vadd.f32 %v3032_v16, %v590_v17 }
 0x1bc   : > { %v598_v19 = vpack.c.bf16 %v597_v18, %v597_v18 }
 0x1be   : > { %3209 = vmatmul.mubr.msk.bf16.vlgmr.msra.gmra.mrb[0].mxu0 %vm569_vm0, %v598_v19 }
 0x1bf   : > { %3229 = vmatprep.mubr.msk.f32.mxu0 %vm3696_vm1, %v3695_v8 }
 0x291   : > { %v659_v21 = vpop.f32.mrb[0].mxu0 }
 0x292   : > { %v4002_v22 = vadd.f32 %v3033_v20, %v659_v21  ;;  %v3210_v23 = vpop.f32.mrb[1].mxu0 }
 0x293   : > { %v662_v24 = vpop.f32.mrb[2].mxu0 }
 0x294   : > { %760 = vrot.lane.b32.xlu0 %v4002_v22, %s4408_s19  ;;  %670 = vrot.lane.b32.xlu1 %v4002_v22, %s3698_s1  ;;  %v3211_v25 = vpop.f32.mrb[3].mxu0  ;;  %s4446_s19 = smov 40  }
 0x298   : > { %839 = vrot.lane.b32.xlu0 %v4002_v22, %s3699_s11 }
 0x306   : > { %v671_v26 = vpop.permute.xlu1 %670  ;;  %v761_v27 = vpop.permute.xlu0 %760 }
 0x307   : > { %3213 = vmatpush3.xpose.msk.msra.mxu1 %vm672_vm2, %v671_v26 }
 0x308   : > { %3217 = vmatprep.subr.mxu1 %v3695_v8 }
 0x30a   : > { %3215 = vmatmul.mubr.msk.f32.vlgmr.msra.gmra.mrb[0].mxu1 %vm672_vm2, %v4002_v22  ;;  %v840_v39 = vpop.permute.xlu0 %839 }
 0x30b   : > { %3218 = vmatpush3.msra.mxu1 %v761_v27  ;;  %3219 = vmatprep.mubr.msk.f32.mxu1 %vm3696_vm1, %v3695_v8 }
 0x30c   : > { %3222 = vmatprep.subr.mxu1 %v3695_v8 }
 0x3dd   : > { %v743_v28 = vpop.f32.mrb[0].mxu1 }
 0x3de   : > { %v747_v30 = vmul.f32 0.35355338, %v743_v28  ;;  %v3216_v31 = vpop.f32.mrb[1].mxu1 }
 0x3e0   : > { %v748_v32 = vadd.f32 %v747_v30, %v4017_v29 }
 0x3e2   : > { %v749_v33 = vsel %vm672_vm2, %v748_v32, -inf }
 0x3e3   : > { %750 = vmax.xlane.f32.xlu1 %v749_v33 }
 0x470   : > { %v751_v34 = vpop.xlane.xlu1 %750 }
 0x471   : > { %v752_v35 = vsub.f32 %v748_v32, %v751_v34 }
 0x473   : > { %v753_v36 = vmul.f32 1.442695, %v752_v35  ;;  %v667_v35 = vld [vmem:[%s4389_s6 + $0x8] sm:$0xf] }
 0x475   : > { %3488 = vpow2.f32 %v753_v36  ;;  %v1270_v36 = vsel %vm1008_vm3, %v667_v35, 0 }
 0x47f   : > { %v3489_v37 = vpop.eup %3488 }
 0x480   : > { %v755_v38 = vsel %vm672_vm2, %v3489_v37, 0.0 }
 0x481   : > { %756 = vadd.xlane.f32.xlu0 %v755_v38 }
 0x497   : > { %837 = vrot.lane.b32.xlu0 %v4002_v22, %s3700_s27 }
 0x50e   : > { %v757_v40 = vpop.xlane.xlu0 %756 }
 0x50f   : > { %3490 = vrcp.f32 %v757_v40 }
 0x512   : > { %v838_v43 = vpop.permute.xlu0 %837 }
 0x519   : > { %v3491_v41 = vpop.eup %3490 }
 0x51a   : > { %v759_v42 = vmul.f32 %v3491_v41, %v3489_v37 }
 0x51c   : > { %3220 = vmatmul.mubr.msk.f32.vlgmr.msra.gmra.mrb[2].mxu1 %vm672_vm2, %v759_v42 }
 0x51d   : > { %3223 = vmatpush3.xpose.msk.msra.mxu1 %vm672_vm2, %v840_v39  ;;  %3224 = vmatprep.mubr.msk.f32.mxu1 %vm3696_vm1, %v3695_v8 }
 0x51e   : > { %3232 = vmatprep.subr.bf16.mxu1 %v3695_v8 }
 0x520   : > { %3225 = vmatmul.mubr.msk.f32.vlgmr.msra.gmra.mrb[4].mxu1 %vm672_vm2, %v838_v43 }
 0x521   : > { %3234 = vmatprep.mubr.msk.bf16.mxu1 %vm3696_vm1, %v3695_v8  ;;  %3233 = vmatpush3.bf16.msra.mxu1 %v1010_v58  ;;  %v668_v58 = vld [vmem:[%s4389_s6 + $0xc] sm:$0xf] }
 0x522   : > { %3244 = vmatprep.subr.mxu1 %v3695_v8 }
 0x5ef   : > { %v832_v44 = vpop.f32.mrb[2].mxu1 }
 0x5f0   : > { %v3221_v45 = vpop.f32.mrb[3].mxu1  ;;  %v836_v1 = vpack.c.bf16 %v832_v44, %v832_v44 }
 0x5f3   : > { %v911_v46 = vpop.f32.mrb[4].mxu1 }
 0x5f4   : > { %v915_v47 = vmul.f32 0.35355338, %v911_v46  ;;  %v3226_v48 = vpop.f32.mrb[5].mxu1 }
 0x5f6   : > { %v916_v49 = vadd.f32 %v915_v47, %v4017_v29 }
 0x5f8   : > { %v917_v50 = vsel %vm672_vm2, %v916_v49, -inf }
 0x5f9   : > { %918 = vmax.xlane.f32.xlu1 %v917_v50 }
 0x60a   : > { %928 = vrot.lane.b32.xlu1 %v4002_v22, %s3701_s29 }
 0x60e   : > { %1100 = vrot.lane.b32.xlu1 %v4002_v22, %s3702_s16 }
 0x612   : > { %1098 = vrot.lane.b32.xlu1 %v4002_v22, %s4413_s26  ;;  %s4444_s26 = smov 104  }
 0x686   : > { %v919_v51 = vpop.xlane.xlu1 %918 }
 0x687   : > { %v920_v52 = vsub.f32 %v916_v49, %v919_v51 }
 0x689   : > { %v921_v53 = vmul.f32 1.442695, %v920_v52 }
 0x68a   : > { %v929_v54 = vpop.permute.xlu1 %928 }
 0x68b   : > { %3492 = vpow2.f32 %v921_v53  ;;  %3228 = vmatpush3.msra.mxu0 %v929_v54 }
 0x68c   : > { %3238 = vmatprep.subr.bf16.mxu0 %v3695_v8 }
 0x68e   : > { %v1101_v6 = vpop.permute.xlu1 %1100 }
 0x692   : > { %v1099_v12 = vpop.permute.xlu1 %1098 }
 0x695   : > { %v3493_v55 = vpop.eup %3492 }
 0x696   : > { %v923_v56 = vsel %vm672_vm2, %v3493_v55, 0.0 }
 0x697   : > { %924 = vadd.xlane.f32.xlu0 %v923_v56 }
 0x6ad   : > { %1189 = vrot.lane.b32.xlu0 %v4002_v22, %s4412_s18 }
 0x6b1   : > { %1315 = vrot.lane.b32.xlu0 %v4002_v22, %s4410_s0  ;;  %s4443_s0 = smov 48  }
 0x724   : > { %v925_v59 = vpop.xlane.xlu0 %924 }
 0x725   : > { %3494 = vrcp.f32 %v925_v59  ;;  %v1485_v59 = vsel %vm1008_vm3, %v668_v58, 0 }
 0x728   : > { %v1190_v2 = vpop.permute.xlu0 %1189 }
 0x72c   : > { %v1316_v30 = vpop.permute.xlu0 %1315 }
 0x72f   : > { %v3495_v61 = vpop.eup %3494 }
 0x730   : > { %v927_v62 = vmul.f32 %v3495_v61, %v3493_v55 }
 0x732   : > { %3230 = vmatmul.mubr.msk.f32.vlgmr.msra.gmra.mrb[4].mxu0 %vm672_vm2, %v927_v62 }
 0x733   : > { %3239 = vmatpush3.bf16.msra.mxu0 %v1056_v63  ;;  %3240 = vmatprep.mubr.msk.bf16.mxu0 %vm3696_vm1, %v3695_v8 }
 0x734   : > { %3249 = vmatprep.subr.mxu0 %v3695_v8 }
 0x736   : > { %3241 = vmatmul.mubr.msk.bf16.vlgmr.msra.gmra.mrb[8].mxu0 %vm672_vm2, %v836_v1 }
 0x737   : > { %3250 = vmatpush3.msra.mxu0 %v1190_v2  ;;  %3251 = vmatprep.mubr.msk.f32.mxu0 %vm3696_vm1, %v3695_v8 }
 0x738   : > { %3260 = vmatprep.subr.mxu0 %v3695_v8 }
 0x805   : > { %v1000_v3 = vpop.f32.mrb[4].mxu0 }
 0x806   : > { %v1004_v4 = vpack.c.bf16 %v1000_v3, %v1000_v3  ;;  %v3231_v5 = vpop.f32.mrb[5].mxu0  ;;  %v3053_v3 = vld [vmem:[%s4390_s7] ss:$0 sm:$0xff] }
 0x808   : > { %3235 = vmatmul.mubr.msk.bf16.vlgmr.msra.gmra.mrb[8].mxu1 %vm672_vm2, %v1004_v4 }
 0x809   : > { %3245 = vmatpush3.xpose.msk.msra.mxu1 %vm672_vm2, %v1101_v6  ;;  %v1092_v7 = vpop.f32.mrb[8].mxu0  ;;  %3246 = vmatprep.mubr.msk.f32.mxu1 %vm3696_vm1, %v3695_v8 }
 0x80a   : > { %v3242_v9 = vpop.f32.mrb[9].mxu0  ;;  %3254 = vmatprep.subr.bf16.mxu1 %v3695_v8 }
 0x80b   : > { %v1095_v10 = vpop.f32.mrb[10].mxu0 }
 0x80c   : > { %v3243_v11 = vpop.f32.mrb[11].mxu0 }
 0x810   : > { %3247 = vmatmul.mubr.msk.f32.vlgmr.msra.gmra.mrb[6].mxu1 %vm672_vm2, %v1099_v12 }
 0x811   : > { %3256 = vmatprep.mubr.msk.bf16.mxu1 %vm3696_vm1, %v3695_v8  ;;  %3255 = vmatpush3.bf16.msra.mxu1 %v1270_v36 }
 0x812   : > { %3270 = vmatprep.subr.bf16.mxu1 %v3695_v8 }
 0x8db   : > { %v1046_v13 = vpop.f32.mrb[8].mxu1 }
 0x8dc   : > { %v1093_v14 = vadd.f32 %v1092_v7, %v1046_v13  ;;  %v3236_v15 = vpop.f32.mrb[9].mxu1 }
 0x8dd   : > { %v1049_v16 = vpop.f32.mrb[10].mxu1  ;;  %v3472_v15 = vld [vmem:[%s4393_s10] sm:$0xff]  }
 0x8de   : > { %v3237_v17 = vpop.f32.mrb[11].mxu1 }
 0x8e3   : > { %v1172_v18 = vpop.f32.mrb[6].mxu1 }
 0x8e4   : > { %v1176_v19 = vmul.f32 0.35355338, %v1172_v18  ;;  %v3248_v20 = vpop.f32.mrb[7].mxu1 }
 0x8e5   : > { %v3054_v20 = vld [vmem:[%s4391_s8] ss:$0 sm:$0xff] }
 0x8e6   : > { %v1177_v21 = vadd.f32 %v1176_v19, %v4017_v29 }
 0x8e8   : > { %v1178_v23 = vsel %vm672_vm2, %v1177_v21, -inf }
 0x8e9   : > { %1179 = vmax.xlane.f32.xlu1 %v1178_v23  ;;  %v3055_v23 = vld [vmem:[%s4392_s9] ss:$0 sm:$0xff] }
 0x976   : > { %v1180_v24 = vpop.xlane.xlu1 %1179 }
 0x977   : > { %v1181_v25 = vsub.f32 %v1177_v21, %v1180_v24 }
 0x979   : > { %v1182_v26 = vmul.f32 1.442695, %v1181_v25 }
 0x97b   : > { %3496 = vpow2.f32 %v1182_v26 }
 0x985   : > { %v3497_v27 = vpop.eup %3496 }
 0x986   : > { %v1184_v28 = vsel %vm672_vm2, %v3497_v27, 0.0 }
 0x987   : > { %1185 = vadd.xlane.f32.xlu0 %v1184_v28  ;;  %v3475_v28 = vld [vmem:[%s4395_s12 + $0x8] sm:$0xff]  }
 0x99d   : > { %1313 = vrot.lane.b32.xlu0 %v4002_v22, %s4411_s14  ;;  %s2917_s14 = scalar_lea.sflag [#allocation4], %s3956_s15 }
 0xa14   : > { %v1186_v31 = vpop.xlane.xlu0 %1185 }
 0xa15   : > { %3498 = vrcp.f32 %v1186_v31  ;;  %v3477_v31 = vld [vmem:[%s4395_s12 + $0x18] sm:$0xff]  }
 0xa18   : > { %v1314_v34 = vpop.permute.xlu0 %1313 }
 0xa1f   : > { %v3499_v32 = vpop.eup %3498 }
 0xa20   : > { %v1188_v33 = vmul.f32 %v3499_v32, %v3497_v27  ;;  %v3474_v27 = vld [vmem:[%s4395_s12] sm:$0xff]   ;;  %v3056_v32 = vld [vmem:[#allocation7] ss:$0 sm:$0xff] }
 0xa22   : > { %3252 = vmatmul.mubr.msk.f32.vlgmr.msra.gmra.mrb[6].mxu0 %vm672_vm2, %v1188_v33 }
 0xa23   : > { %3261 = vmatpush3.xpose.msk.msra.mxu0 %vm672_vm2, %v1316_v30  ;;  %3262 = vmatprep.mubr.msk.f32.mxu0 %vm3696_vm1, %v3695_v8  ;;  %v3476_v30 = vld [vmem:[%s4395_s12 + $0x10] sm:$0xff]  }
 0xa24   : > { %3265 = vmatprep.subr.mxu0 %v3695_v8 }
 0xa26   : > { %3263 = vmatmul.mubr.msk.f32.vlgmr.msra.gmra.mrb[12].mxu0 %vm672_vm2, %v1314_v34 }
 0xa27   : > { %3267 = vmatprep.mubr.msk.f32.mxu0 %vm3696_vm1, %v3695_v8 }
 0xaf5   : > { %v1261_v37 = vpop.f32.mrb[6].mxu0 }
 0xaf6   : > { %v1265_v38 = vpack.c.bf16 %v1261_v37, %v1261_v37  ;;  %v3253_v39 = vpop.f32.mrb[7].mxu0 }
 0xaf8   : > { %3257 = vmatmul.mubr.msk.bf16.vlgmr.msra.gmra.mrb[12].mxu1 %vm672_vm2, %v1265_v38 }
 0xaf9   : > { %v1387_v40 = vpop.f32.mrb[12].mxu0  ;;  %3272 = vmatprep.mubr.msk.bf16.mxu1 %vm3696_vm1, %v3695_v8  ;;  %3271 = vmatpush3.bf16.msra.mxu1 %v1485_v59 }
 0xafa   : > { %v1391_v41 = vmul.f32 0.35355338, %v1387_v40  ;;  %v3264_v42 = vpop.f32.mrb[13].mxu0  ;;  %3284 = vmatprep.subr.bf16.mxu1 %v3695_v8 }
 0xafc   : > { %v1392_v43 = vadd.f32 %v1391_v41, %v4017_v29 }
 0xafe   : > { %v1393_v44 = vsel %vm672_vm2, %v1392_v43, -inf }
 0xaff   : > { %1394 = vmax.xlane.f32.xlu1 %v1393_v44  ;;  %v3060_v44 = vld [vmem:[%s4396_s13] ss:$0 sm:$0xff] }
 0xb10   : > { %1404 = vrot.lane.b32.xlu1 %v4002_v22, %s4409_s30  ;;  %s4445_s30 = smov 72  }
 0xb8c   : > { %v1395_v45 = vpop.xlane.xlu1 %1394 }
 0xb8d   : > { %v1396_v46 = vsub.f32 %v1392_v43, %v1395_v45 }
 0xb8f   : > { %v1397_v47 = vmul.f32 1.442695, %v1396_v46 }
 0xb90   : > { %v1405_v48 = vpop.permute.xlu1 %1404 }
 0xb91   : > { %3500 = vpow2.f32 %v1397_v47  ;;  %3266 = vmatpush3.msra.mxu0 %v1405_v48 }
 0xb92   : > { %3276 = vmatprep.subr.bf16.mxu0 %v3695_v8 }
 0xb9b   : > { %v3501_v49 = vpop.eup %3500 }
 0xb9c   : > { %v1399_v50 = vsel %vm672_vm2, %v3501_v49, 0.0 }
 0xb9d   : > { %1400 = vadd.xlane.f32.xlu0 %v1399_v50 }
 0xbcb   : > { %v1306_v51 = vpop.f32.mrb[12].mxu1 }
 0xbcc   : > { %v1312_v52 = vadd.f32 %v1306_v51, %v1093_v14  ;;  %v3258_v53 = vpop.f32.mrb[13].mxu1 }
 0xbcd   : > { %v1309_v54 = vpop.f32.mrb[14].mxu1 }
 0xbce   : > { %v3259_v55 = vpop.f32.mrb[15].mxu1 }
 0xc2a   : > { %v1401_v56 = vpop.xlane.xlu0 %1400 }
 0xc2b   : > { %3502 = vrcp.f32 %v1401_v56 }
 0xc35   : > { %v3503_v22 = vpop.eup %3502 }
 0xc36   : > { %v1403_v57 = vmul.f32 %v3503_v22, %v3501_v49  ;;  %v3478_v22 = vld [vmem:[%s4387_s4 + $0x10] sm:$0xff]  }
 0xc38   : > { %3268 = vmatmul.mubr.msk.f32.vlgmr.msra.gmra.mrb[14].mxu0 %vm672_vm2, %v1403_v57  ;;  %v3479_v57 = vld [vmem:[%s4387_s4 + $0x18] sm:$0xff]  }
 0xc39   : > { %3280 = vmatprep.mubr.msk.bf16.mxu0 %vm3696_vm1, %v3695_v8  ;;  %3277 = vmatpush3.bf16.msra.mxu0 %v3472_v15 }
 0xc3a   : > { %3278 = vmatprep.subr.bf16.mxu0 %v3695_v8 }
 0xd0b   : > { %v1476_v60 = vpop.f32.mrb[14].mxu0 }
 0xd0c   : > { %v1480_v61 = vpack.c.bf16 %v1476_v60, %v1476_v60  ;;  %v3269_v62 = vpop.f32.mrb[15].mxu0 }
 0xd0d   : > { %v3068_v62 = vld [vmem:[%s4439_s2 + $0x1] ss:$0 sm:$0xff]  ;;  %s4450_s2 = sld [smem:[#allocation22_spill]] }
 0xd0e   : > { %3273 = vmatmul.mubr.msk.bf16.vlgmr.msra.gmra.mrb[16].mxu1 %vm672_vm2, %v1480_v61 }
 0xd0f   : > { %3292 = vmatprep.mubr.msk.bf16.mxu1 %vm3696_vm1, %v3695_v8  ;;  %3285 = vmatpush3.bf16.msra.mxu1 %v3474_v27 }
 0xd10   : > { %3286 = vmatprep.subr.bf16.mxu1 %v3695_v8 }
 0xd13   : > { %3287 = vmatpush3.bf16.msra.mxu1 %v3475_v28 }
 0xd14   : > { %3288 = vmatprep.subr.bf16.mxu1 %v3695_v8 }
 0xd17   : > { %3289 = vmatpush3.bf16.msra.mxu1 %v3476_v30 }
 0xd18   : > { %3290 = vmatprep.subr.bf16.mxu1 %v3695_v8 }
 0xd1b   : > { %3291 = vmatpush3.bf16.msra.mxu1 %v3477_v31 }
 0xd1c   : > { %3309 = vmatprep.subr.mxu1 %v3695_v8 }
 0xde1   : > { %v1521_v63 = vpop.f32.mrb[16].mxu1 }
 0xde2   : > { %v1527_v1 = vadd.f32 %v1521_v63, %v1312_v52  ;;  %v3274_v2 = vpop.f32.mrb[17].mxu1 }
 0xde3   : > { %v1524_v4 = vpop.f32.mrb[18].mxu1 }
 0xde4   : > { %v1528_v5 = vadd.f32 %v1527_v1, %v3970_v0  ;;  %v3275_v6 = vpop.f32.mrb[19].mxu1  ;;  %v3473_v0 = vld [vmem:[%s4393_s10 + $0x8] sm:$0xff]   ;;  %v3069_v1 = vld [vmem:[%s4440_s3 + $0x1] ss:$0 sm:$0xff] }
 0xde5   : > { %3279 = vmatpush3.bf16.msra.mxu0 %v3473_v0 }
 0xde6   : > { %v1536_v7 = vadd.f32 %v3053_v3, %v1528_v5  ;;  %3296 = vmatprep.subr.bf16.mxu0 %v3695_v8  ;;  %v3075_v5 = vld [vmem:[%s4388_s5 + $0x1] ss:$0 sm:$0xff] }
 0xde8   : > { %v1539_v9 = vsel %vm569_vm0, %v1536_v7, 0.0 }
 0xde9   : > { %1540 = vadd.xlane.f32.xlu1 %v1539_v9 }
 0xe76   : > { %v1541_v10 = vpop.xlane.xlu1 %1540 }
 0xe77   : > { %v1542_v11 = vmul.f32 0.03125, %v1541_v10 }
 0xe79   : > { %v1543_v12 = vsub.f32 %v1536_v7, %v1542_v11 }
 0xe7b   : > { %v1544_v13 = vmul.f32 %v1543_v12, %v1543_v12 }
 0xe7d   : > { %v1545_v14 = vsel %vm569_vm0, %v1544_v13, 0.0 }
 0xe7e   : > { %1546 = vadd.xlane.f32.xlu0 %v1545_v14 }
 0xf0b   : > { %v1547_v16 = vpop.xlane.xlu0 %1546 }
 0xf0c   : > { %v1548_v17 = vmul.f32 0.03125, %v1547_v16 }
 0xf0e   : > { %v1549_v18 = vadd.f32 1e-06, %v1548_v17 }
 0xf10   : > { %3504 = vrsqrt.f32 %v1549_v18 }
 0xf1a   : > { %v3505_v19 = vpop.eup %3504 }
 0xf1b   : > { %v1551_v21 = vmul.f32 %v3505_v19, %v1543_v12 }
 0xf1d   : > { %v1558_v24 = vmul.f32 %v3054_v20, %v1551_v21 }
 0xf1f   : > { %v1565_v25 = vadd.f32 %v3055_v23, %v1558_v24 }
 0xf21   : > { %v1566_v26 = vpack.c.bf16 %v1565_v25, %v1565_v25 }
 0xf23   : > { %3281 = vmatmul.mubr.msk.bf16.vlgmr.msra.gmra.mrb[16].mxu0 %vm569_vm0, %v1566_v26 }
 0xf24   : > { %3300 = vmatprep.mubr.msk.bf16.mxu0 %vm3696_vm1, %v3695_v8  ;;  %3297 = vmatpush3.bf16.msra.mxu0 %v3478_v22 }
 0xf25   : > { %3298 = vmatprep.subr.bf16.mxu0 %v3695_v8 }
 0xf28   : > { %3299 = vmatpush3.bf16.msra.mxu0 %v3479_v57 }
 0xf29   : > { %3304 = vmatprep.subr.mxu0 %v3695_v8 }
 0xff6   : > { %v1627_v33 = vpop.f32.mrb[16].mxu0 }
 0xff7   : > { %v1628_v34 = vadd.f32 %v3056_v32, %v1627_v33  ;;  %v3282_v35 = vpop.f32.mrb[17].mxu0 }
 0xff8   : > { %v1630_v36 = vpop.f32.mrb[18].mxu0 }
 0xff9   : > { %v1634_v37 = vmul.f32 0.70710677, %v1628_v34  ;;  %v3283_v38 = vpop.f32.mrb[19].mxu0  ;;  %v1633_v40 = vmul.f32 0.5, %v1628_v34  ;;  %v3080_v36 = vld [vmem:[%s4389_s6 + $0x14] sm:$0xf] }
 0xffb   : > { %3506 = verf.f32 %v1634_v37  ;;  %v2167_v37 = vsel %vm1008_vm3, %v3080_v36, 0 }
0x1005   : > { %v3507_v39 = vpop.eup %3506 }
0x1006   : > { %v1636_v41 = vadd.f32 1.0, %v3507_v39 }
0x1008   : > { %v1637_v42 = vmul.f32 %v1636_v41, %v1633_v40 }
0x100a   : > { %v1638_v43 = vpack.c.bf16 %v1637_v42, %v1637_v42 }
0x100c   : > { %3293 = vmatmul.mubr.msk.bf16.vlgmr.msra.gmra.mrb[20].mxu1 %vm1678_vm4, %v1638_v43 }
0x100d   : > { %3311 = vmatprep.mubr.msk.f32.mxu1 %vm3696_vm1, %v3695_v8 }
0x10df   : > { %v1716_v45 = vpop.f32.mrb[20].mxu1 }
0x10e0   : > { %v1717_v46 = vadd.f32 %v3060_v44, %v1716_v45  ;;  %v3294_v47 = vpop.f32.mrb[21].mxu1 }
0x10e1   : > { %v1719_v48 = vpop.f32.mrb[22].mxu1 }
0x10e2   : > { %v4154_v49 = vadd.f32 %v1717_v46, %v1536_v7  ;;  %v3295_v50 = vpop.f32.mrb[23].mxu1  ;;  %v3079_v46 = vld [vmem:[%s4389_s6 + $0x10] sm:$0xf] }
0x10e3   : > { %v2213_v47 = vsel %vm1008_vm3, %v3079_v46, 0 }
0x10e4   : > { %v1727_v51 = vsel %vm569_vm0, %v4154_v49, 0.0 }
0x10e5   : > { %1728 = vadd.xlane.f32.xlu0 %v1727_v51 }
0x1172   : > { %v1729_v52 = vpop.xlane.xlu0 %1728 }
0x1173   : > { %v1730_v53 = vmul.f32 0.03125, %v1729_v52 }
0x1175   : > { %v1731_v54 = vsub.f32 %v4154_v49, %v1730_v53 }
0x1177   : > { %v1732_v55 = vmul.f32 %v1731_v54, %v1731_v54 }
0x1179   : > { %v1733_v56 = vsel %vm569_vm0, %v1732_v55, 0.0 }
0x117a   : > { %1734 = vadd.xlane.f32.xlu0 %v1733_v56 }
0x1207   : > { %v1735_v58 = vpop.xlane.xlu0 %1734 }
0x1208   : > { %v1736_v59 = vmul.f32 0.03125, %v1735_v58 }
0x120a   : > { %v1737_v60 = vadd.f32 1e-06, %v1736_v59 }
0x120c   : > { %3508 = vrsqrt.f32 %v1737_v60 }
0x1216   : > { %v3509_v61 = vpop.eup %3508 }
0x1217   : > { %v1739_v63 = vmul.f32 %v3509_v61, %v1731_v54 }
0x1219   : > { %v1746_v2 = vmul.f32 %v3068_v62, %v1739_v63 }
0x121b   : > { %v1753_v3 = vadd.f32 %v3069_v1, %v1746_v2 }
0x121d   : > { %v1754_v4 = vpack.c.bf16 %v1753_v3, %v1753_v3 }
0x121f   : > { %3301 = vmatmul.mubr.msk.bf16.vlgmr.msra.gmra.mrb[20].mxu0 %vm569_vm0, %v1754_v4 }
0x1220   : > { %3306 = vmatprep.mubr.msk.f32.mxu0 %vm3696_vm1, %v3695_v8 }
0x12f2   : > { %v1817_v6 = vpop.f32.mrb[20].mxu0 }
0x12f3   : > { %v4180_v7 = vadd.f32 %v3075_v5, %v1817_v6  ;;  %v3302_v9 = vpop.f32.mrb[21].mxu0 }
0x12f4   : > { %v1820_v10 = vpop.f32.mrb[22].mxu0 }
0x12f5   : > { %1997 = vrot.lane.b32.xlu1 %v4180_v7, %s3699_s11  ;;  %1829 = vrot.lane.b32.xlu0 %v4180_v7, %s3698_s1  ;;  %v3303_v11 = vpop.f32.mrb[23].mxu0  ;;  %s4441_s1 = smov 112   ;;  %s4442_s11 = smov 64  }
0x12f9   : > { %1995 = vrot.lane.b32.xlu0 %v4180_v7, %s3700_s27 }
0x1367   : > { %v1830_v12 = vpop.permute.xlu0 %1829  ;;  %v1998_v13 = vpop.permute.xlu1 %1997 }
0x1368   : > { %3305 = vmatpush3.xpose.msk.msra.mxu0 %vm672_vm2, %v1830_v12 }
0x1369   : > { %3314 = vmatprep.subr.mxu0 %v3695_v8 }
0x136b   : > { %3307 = vmatmul.mubr.msk.f32.vlgmr.msra.gmra.mrb[24].mxu0 %vm672_vm2, %v4180_v7  ;;  %v1996_v14 = vpop.permute.xlu0 %1995 }
0x136c   : > { %3315 = vmatpush3.xpose.msk.msra.mxu0 %vm672_vm2, %v1998_v13  ;;  %3316 = vmatprep.mubr.msk.f32.mxu0 %vm3696_vm1, %v3695_v8 }
0x136d   : > { %3324 = vmatprep.subr.bf16.mxu0 %v3695_v8 }
0x136f   : > { %3317 = vmatmul.mubr.msk.f32.vlgmr.msra.gmra.mrb[26].mxu0 %vm672_vm2, %v1996_v14 }
0x1370   : > { %3326 = vmatprep.mubr.msk.bf16.mxu0 %vm3696_vm1, %v3695_v8  ;;  %3325 = vmatpush3.bf16.msra.mxu0 %v2167_v37 }
0x1371   : > { %3336 = vmatprep.subr.mxu0 %v3695_v8 }
0x143e   : > { %v1901_v15 = vpop.f32.mrb[24].mxu0 }
0x143f   : > { %v1905_v0 = vmul.f32 0.35355338, %v1901_v15  ;;  %v3308_v16 = vpop.f32.mrb[25].mxu0 }
0x1441   : > { %v1906_v17 = vadd.f32 %v1905_v0, %v4017_v29 }
0x1442   : > { %v2069_v18 = vpop.f32.mrb[26].mxu0 }
0x1443   : > { %v2073_v19 = vmul.f32 0.35355338, %v2069_v18  ;;  %v3318_v20 = vpop.f32.mrb[27].mxu0  ;;  %v1907_v21 = vsel %vm672_vm2, %v1906_v17, -inf }
0x1444   : > { %1908 = vmax.xlane.f32.xlu0 %v1907_v21 }
0x1445   : > { %v2074_v23 = vadd.f32 %v2073_v19, %v4017_v29  ;;  %v3081_v19 = vld [vmem:[%s4389_s6 + $0x18] sm:$0xf] }
0x1446   : > { %v2427_v20 = vsel %vm1008_vm3, %v3081_v19, 0 }
0x1447   : > { %v2075_v24 = vsel %vm672_vm2, %v2074_v23, -inf }
0x1448   : > { %2076 = vmax.xlane.f32.xlu1 %v2075_v24 }
0x1459   : > { %2086 = vrot.lane.b32.xlu1 %v4180_v7, %s3701_s29  ;;  %s4448_s29 = sld [smem:[#allocation21_spill]] }
0x145d   : > { %2257 = vrot.lane.b32.xlu1 %v4180_v7, %s3702_s16  ;;  %s3131_s16 = sshll.u32 %s3815_s25, 7  ;;  %s3708_s25 = smov [#allocation8]  }
0x145e   : > { %s4338_s3 = scalar_lea.hbm %s4450_s2, %s3131_s16 }
0x1461   : > { %2255 = vrot.lane.b32.xlu1 %v4180_v7, %s4441_s1  ;;  %s4447_s1 = sld [smem:[#allocation20_spill]] }
0x14d1   : > { %v1909_v25 = vpop.xlane.xlu0 %1908 }
0x14d2   : > { %v1910_v26 = vsub.f32 %v1906_v17, %v1909_v25 }
0x14d4   : > { %v1911_v27 = vmul.f32 1.442695, %v1910_v26 }
0x14d5   : > { %v2077_v28 = vpop.xlane.xlu1 %2076 }
0x14d6   : > { %3510 = vpow2.f32 %v1911_v27  ;;  %v2078_v30 = vsub.f32 %v2074_v23, %v2077_v28 }
0x14d8   : > { %v2079_v31 = vmul.f32 1.442695, %v2078_v30 }
0x14d9   : > { %v2087_v43 = vpop.permute.xlu1 %2086 }
0x14da   : > { %3512 = vpow2.f32 %v2079_v31 }
0x14dd   : > { %v2258_v55 = vpop.permute.xlu1 %2257 }
0x14e0   : > { %v3511_v32 = vpop.eup %3510 }
0x14e1   : > { %v1913_v33 = vsel %vm672_vm2, %v3511_v32, 0.0  ;;  %v2256_v56 = vpop.permute.xlu1 %2255 }
0x14e2   : > { %1914 = vadd.xlane.f32.xlu0 %v1913_v33 }
0x14e4   : > { %v3513_v34 = vpop.eup %3512 }
0x14e5   : > { %v2081_v35 = vsel %vm672_vm2, %v3513_v34, 0.0 }
0x14e6   : > { %2082 = vadd.xlane.f32.xlu0 %v2081_v35 }
0x14fc   : > { %1918 = vrot.lane.b32.xlu0 %v4180_v7, %s4442_s11 }
0x156f   : > { %v1915_v38 = vpop.xlane.xlu0 %1914 }
0x1570   : > { %3514 = vrcp.f32 %v1915_v38 }
0x1573   : > { %v2083_v39 = vpop.xlane.xlu0 %2082 }
0x1574   : > { %3516 = vrcp.f32 %v2083_v39 }
0x1577   : > { %v1919_v40 = vpop.permute.xlu0 %1918 }
0x1578   : > { %3310 = vmatpush3.msra.mxu1 %v1919_v40 }
0x1579   : > { %3319 = vmatprep.subr.mxu1 %v3695_v8 }
0x157a   : > { %v3515_v41 = vpop.eup %3514 }
0x157b   : > { %v1917_v42 = vmul.f32 %v3515_v41, %v3511_v32 }
0x157d   : > { %3312 = vmatmul.mubr.msk.f32.vlgmr.msra.gmra.mrb[24].mxu1 %vm672_vm2, %v1917_v42 }
0x157e   : > { %v3517_v44 = vpop.eup %3516  ;;  %3320 = vmatpush3.msra.mxu1 %v2087_v43  ;;  %3321 = vmatprep.mubr.msk.f32.mxu1 %vm3696_vm1, %v3695_v8 }
0x157f   : > { %v2085_v45 = vmul.f32 %v3517_v44, %v3513_v34  ;;  %3330 = vmatprep.subr.bf16.mxu1 %v3695_v8 }
0x1581   : > { %3322 = vmatmul.mubr.msk.f32.vlgmr.msra.gmra.mrb[26].mxu1 %vm672_vm2, %v2085_v45 }
0x1582   : > { %3332 = vmatprep.mubr.msk.bf16.mxu1 %vm3696_vm1, %v3695_v8  ;;  %3331 = vmatpush3.bf16.msra.mxu1 %v2213_v47 }
0x1583   : > { %3341 = vmatprep.subr.mxu1 %v3695_v8 }
0x1650   : > { %v1990_v48 = vpop.f32.mrb[24].mxu1 }
0x1651   : > { %v1994_v50 = vpack.c.bf16 %v1990_v48, %v1990_v48  ;;  %v3313_v51 = vpop.f32.mrb[25].mxu1 }
0x1653   : > { %3333 = vmatmul.mubr.msk.bf16.vlgmr.msra.gmra.mrb[28].mxu1 %vm672_vm2, %v1994_v50 }
0x1654   : > { %v2158_v52 = vpop.f32.mrb[26].mxu1  ;;  %3343 = vmatprep.mubr.msk.f32.mxu1 %vm3696_vm1, %v3695_v8 }
0x1655   : > { %v2162_v53 = vpack.c.bf16 %v2158_v52, %v2158_v52  ;;  %v3323_v54 = vpop.f32.mrb[27].mxu1  ;;  %v3100_v52 = vld [vmem:[%s4390_s7 + $0x1] ss:$0 sm:$0xff] }
0x1657   : > { %3327 = vmatmul.mubr.msk.bf16.vlgmr.msra.gmra.mrb[28].mxu0 %vm672_vm2, %v2162_v53 }
0x1658   : > { %3337 = vmatpush3.xpose.msk.msra.mxu0 %vm672_vm2, %v2258_v55  ;;  %3338 = vmatprep.mubr.msk.f32.mxu0 %vm3696_vm1, %v3695_v8 }
0x1659   : > { %3346 = vmatprep.subr.bf16.mxu0 %v3695_v8 }
0x165f   : > { %3339 = vmatmul.mubr.msk.f32.vlgmr.msra.gmra.mrb[32].mxu0 %vm672_vm2, %v2256_v56 }
0x1660   : > { %3348 = vmatprep.mubr.msk.bf16.mxu0 %vm3696_vm1, %v3695_v8  ;;  %3347 = vmatpush3.bf16.msra.mxu0 %v2427_v20 }
0x1661   : > { %3376 = vmatprep.subr.bf16.mxu0 %v3695_v8 }
0x1726   : > { %v2249_v22 = vpop.f32.mrb[28].mxu1 }
0x1727   : > { %v3334_v57 = vpop.f32.mrb[29].mxu1 }
0x1728   : > { %v2252_v58 = vpop.f32.mrb[30].mxu1 }
0x1729   : > { %v3335_v59 = vpop.f32.mrb[31].mxu1 }
0x172a   : > { %v2203_v60 = vpop.f32.mrb[28].mxu0 }
0x172b   : > { %v2250_v61 = vadd.f32 %v2249_v22, %v2203_v60  ;;  %v3328_v62 = vpop.f32.mrb[29].mxu0 }
0x172c   : > { %v2206_v63 = vpop.f32.mrb[30].mxu0  ;;  %v3480_v62 = vld [vmem:[%s4393_s10 + $0x10] sm:$0xff]  }
0x172d   : > { %v3329_v1 = vpop.f32.mrb[31].mxu0 }
0x1732   : > { %v2329_v2 = vpop.f32.mrb[32].mxu0 }
0x1733   : > { %v2333_v3 = vmul.f32 0.35355338, %v2329_v2  ;;  %v3340_v4 = vpop.f32.mrb[33].mxu0 }
0x1734   : > { %v3103_v4 = vld [vmem:[%s4391_s8 + $0x1] ss:$0 sm:$0xff] }
0x1735   : > { %v2334_v5 = vadd.f32 %v2333_v3, %v4017_v29 }
0x1737   : > { %v2335_v6 = vsel %vm672_vm2, %v2334_v5, -inf }
0x1738   : > { %2336 = vmax.xlane.f32.xlu0 %v2335_v6  ;;  %v3104_v6 = vld [vmem:[%s4392_s9 + $0x1] ss:$0 sm:$0xff] }
0x174e   : > { %2346 = vrot.lane.b32.xlu0 %v4180_v7, %s4443_s0  ;;  %s563_s0 = scalar_lea.vmem [#allocation8], %s4449_s21 }
0x1752   : > { %2470 = vrot.lane.b32.xlu0 %v4180_v7, %s4444_s26  ;;  %s2930_s26 = sshll.u32 %s563_s0, 4  ;;  %s4340_s26 = int_to_ptr.vmem [resolvable:$true] %s2930_s26 }
0x17c5   : > { %v2337_v9 = vpop.xlane.xlu0 %2336 }
0x17c6   : > { %v2338_v10 = vsub.f32 %v2334_v5, %v2337_v9 }
0x17c8   : > { %v2339_v11 = vmul.f32 1.442695, %v2338_v10 }
0x17c9   : > { %v2347_v12 = vpop.permute.xlu0 %2346 }
0x17ca   : > { %3518 = vpow2.f32 %v2339_v11  ;;  %3342 = vmatpush3.msra.mxu1 %v2347_v12  ;;  %v3482_v12 = vld [vmem:[%s4395_s12 + $0x20] sm:$0xff]  }
0x17cb   : > { %3352 = vmatprep.subr.mxu1 %v3695_v8 }
0x17cd   : > { %v2471_v18 = vpop.permute.xlu0 %2470 }
0x17d4   : > { %v3519_v13 = vpop.eup %3518 }
0x17d5   : > { %v2341_v14 = vsel %vm672_vm2, %v3519_v13, 0.0 }
0x17d6   : > { %2342 = vadd.xlane.f32.xlu1 %v2341_v14  ;;  %v3484_v14 = vld [vmem:[%s4395_s12 + $0x30] sm:$0xff]  }
0x17e7   : > { %2472 = vrot.lane.b32.xlu1 %v4180_v7, %s4445_s30 }
0x1863   : > { %v2343_v15 = vpop.xlane.xlu1 %2342 }
0x1864   : > { %3520 = vrcp.f32 %v2343_v15  ;;  %v3485_v15 = vld [vmem:[%s4395_s12 + $0x38] sm:$0xff]  }
0x1867   : > { %v2473_v17 = vpop.permute.xlu1 %2472 }
0x186e   : > { %v3521_v0 = vpop.eup %3520 }
0x186f   : > { %v2345_v16 = vmul.f32 %v3521_v0, %v3519_v13  ;;  %v3483_v13 = vld [vmem:[%s4395_s12 + $0x28] sm:$0xff]   ;;  %v3109_v0 = vld [vmem:[#allocation7 + $0x1] ss:$0 sm:$0xff] }
0x1871   : > { %3344 = vmatmul.mubr.msk.f32.vlgmr.msra.gmra.mrb[32].mxu1 %vm672_vm2, %v2345_v16 }
0x1872   : > { %3353 = vmatpush3.xpose.msk.msra.mxu1 %vm672_vm2, %v2473_v17  ;;  %3354 = vmatprep.mubr.msk.f32.mxu1 %vm3696_vm1, %v3695_v8 }
0x1873   : > { %3357 = vmatprep.subr.mxu1 %v3695_v8 }
0x1875   : > { %3355 = vmatmul.mubr.msk.f32.vlgmr.msra.gmra.mrb[34].mxu1 %vm672_vm2, %v2471_v18 }
0x1876   : > { %3359 = vmatprep.mubr.msk.f32.mxu1 %vm3696_vm1, %v3695_v8 }
0x1944   : > { %v2418_v21 = vpop.f32.mrb[32].mxu1 }
0x1945   : > { %v2422_v23 = vpack.c.bf16 %v2418_v21, %v2418_v21  ;;  %v3345_v24 = vpop.f32.mrb[33].mxu1 }
0x1947   : > { %3349 = vmatmul.mubr.msk.bf16.vlgmr.msra.gmra.mrb[36].mxu0 %vm672_vm2, %v2422_v23 }
0x1948   : > { %v2544_v25 = vpop.f32.mrb[34].mxu1  ;;  %3384 = vmatprep.mubr.msk.bf16.mxu0 %vm3696_vm1, %v3695_v8  ;;  %3377 = vmatpush3.bf16.msra.mxu0 %v3482_v12 }
0x1949   : > { %v2548_v26 = vmul.f32 0.35355338, %v2544_v25  ;;  %v3356_v27 = vpop.f32.mrb[35].mxu1  ;;  %3378 = vmatprep.subr.bf16.mxu0 %v3695_v8 }
0x194b   : > { %v2549_v28 = vadd.f32 %v2548_v26, %v4017_v29 }
0x194c   : > { %3379 = vmatpush3.bf16.msra.mxu0 %v3483_v13 }
0x194d   : > { %v2550_v30 = vsel %vm672_vm2, %v2549_v28, -inf  ;;  %3380 = vmatprep.subr.bf16.mxu0 %v3695_v8 }
0x194e   : > { %2551 = vmax.xlane.f32.xlu1 %v2550_v30 }
0x1950   : > { %3381 = vmatpush3.bf16.msra.mxu0 %v3484_v14 }
0x1951   : > { %3382 = vmatprep.subr.bf16.mxu0 %v3695_v8 }
0x1954   : > { %3383 = vmatpush3.bf16.msra.mxu0 %v3485_v15 }
0x19db   : > { %v2552_v31 = vpop.xlane.xlu1 %2551 }
0x19dc   : > { %v2553_v32 = vsub.f32 %v2549_v28, %v2552_v31 }
0x19de   : > { %v2554_v33 = vmul.f32 1.442695, %v2553_v32 }
0x19e0   : > { %3522 = vpow2.f32 %v2554_v33 }
0x19ea   : > { %v3523_v34 = vpop.eup %3522 }
0x19eb   : > { %v2556_v35 = vsel %vm672_vm2, %v3523_v34, 0.0 }
0x19ec   : > { %2557 = vadd.xlane.f32.xlu0 %v2556_v35 }
0x1a02   : > { %2561 = vrot.lane.b32.xlu0 %v4180_v7, %s4446_s19  ;;  %v3082_v7 = vld [vmem:[%s4389_s6 + $0x1c] sm:$0xf]  ;;  %s3618_s19 = scalar_lea.vmem %s4340_s26, 128 }
0x1a03   : > { %v2642_v44 = vsel %vm1008_vm3, %v3082_v7, 0  ;;  %v3128_v7 = vld [vmem:[%s4447_s1] ss:$0 sm:$0xff]  ;;  %p3619_p2 = scmp.ne.s32.totalorder %s4340_s26, %s3618_s19  ;;  %s3622_s1 = sshll.u32 %s3708_s25, 4  ;;  %s3623_s1 = int_to_ptr.vmem [resolvable:$false] %s3622_s1 }
0x1a04   : > { %s3624_s11 = scalar_lea.vmem %s3623_s1, 256  ;;  %p3625_p8 = scmp.lt.s32.totalorder %s4340_s26, %s3623_s1 }
0x1a05   : > { %p3620_p1 = pnand %p3619_p2, %p3907_p4  ;;  %p3626_p12 = scmp.lt.s32.totalorder %s3624_s11, %s3618_s19 }
0x1a07   : > { %p3621_p6 = pneg %p3620_p1  ;;  %p3627_p3 = por %p3626_p12, %p3625_p8 }
0x1a09   : > { %p3628_p7 = pnand %p3627_p3, %p3621_p6 }
0x1a1a   : > { %v2463_v36 = vpop.f32.mrb[36].mxu0 }
0x1a1b   : > { %v2469_v37 = vadd.f32 %v2463_v36, %v2250_v61  ;;  %v3350_v38 = vpop.f32.mrb[37].mxu0 }
0x1a1c   : > { %v2466_v39 = vpop.f32.mrb[38].mxu0 }
0x1a1d   : > { %v3351_v40 = vpop.f32.mrb[39].mxu0 }
0x1a79   : > { %v2558_v29 = vpop.xlane.xlu0 %2557 }
0x1a7a   : > { %3524 = vrcp.f32 %v2558_v29 }
0x1a7d   : > { %v2562_v41 = vpop.permute.xlu0 %2561 }
0x1a7e   : > { %3358 = vmatpush3.msra.mxu1 %v2562_v41 }
0x1a7f   : > { %3362 = vmatprep.subr.bf16.mxu1 %v3695_v8 }
0x1a84   : > { %v3525_v42 = vpop.eup %3524 }
0x1a85   : > { %v2560_v43 = vmul.f32 %v3525_v42, %v3523_v34 }
0x1a87   : > { %3360 = vmatmul.mubr.msk.f32.vlgmr.msra.gmra.mrb[36].mxu1 %vm672_vm2, %v2560_v43 }
0x1a88   : > { %3364 = vmatprep.mubr.msk.bf16.mxu1 %vm3696_vm1, %v3695_v8  ;;  %3363 = vmatpush3.bf16.msra.mxu1 %v2642_v44 }
0x1a89   : > { %3368 = vmatprep.subr.bf16.mxu1 %v3695_v8 }
0x1b5a   : > { %v2633_v45 = vpop.f32.mrb[36].mxu1 }
0x1b5b   : > { %v2637_v46 = vpack.c.bf16 %v2633_v45, %v2633_v45  ;;  %v3361_v47 = vpop.f32.mrb[37].mxu1  ;;  %v3129_v45 = vld [vmem:[%s4448_s29] ss:$0 sm:$0xff] }
0x1b5d   : > { %3365 = vmatmul.mubr.msk.bf16.vlgmr.msra.gmra.mrb[40].mxu1 %vm672_vm2, %v2637_v46 }
0x1b5e   : > { %3372 = vmatprep.mubr.msk.bf16.mxu1 %vm3696_vm1, %v3695_v8  ;;  %3369 = vmatpush3.bf16.msra.mxu1 %v3480_v62 }
0x1b5f   : > { %3370 = vmatprep.subr.bf16.mxu1 %v3695_v8  ;;  %v3122_v8 = vld [vmem:[%s4396_s13 + $0x1] ss:$0 sm:$0xff] }
0x1c30   : > { %v2678_v48 = vpop.f32.mrb[40].mxu1 }
0x1c31   : > { %v2684_v50 = vadd.f32 %v2678_v48, %v2469_v37  ;;  %v3366_v51 = vpop.f32.mrb[41].mxu1 }
0x1c32   : > { %v2681_v53 = vpop.f32.mrb[42].mxu1 }
0x1c33   : > { %v2685_v54 = vadd.f32 %v2684_v50, %v4154_v49  ;;  %v3367_v55 = vpop.f32.mrb[43].mxu1  ;;  %v3481_v49 = vld [vmem:[%s4393_s10 + $0x18] sm:$0xff]  }
0x1c34   : > { %3371 = vmatpush3.bf16.msra.mxu1 %v3481_v49 }
0x1c35   : > { %v2694_v56 = vadd.f32 %v3100_v52, %v2685_v54 }
0x1c37   : > { %v2699_v22 = vsel %vm569_vm0, %v2694_v56, 0.0 }
0x1c38   : > { %2700 = vadd.xlane.f32.xlu1 %v2699_v22 }
0x1cc5   : > { %v2701_v57 = vpop.xlane.xlu1 %2700 }
0x1cc6   : > { %v2702_v58 = vmul.f32 0.03125, %v2701_v57 }
0x1cc8   : > { %v2703_v59 = vsub.f32 %v2694_v56, %v2702_v58 }
0x1cca   : > { %v2704_v60 = vmul.f32 %v2703_v59, %v2703_v59 }
0x1ccc   : > { %v2705_v61 = vsel %vm569_vm0, %v2704_v60, 0.0 }
0x1ccd   : > { %2706 = vadd.xlane.f32.xlu1 %v2705_v61 }
0x1d5a   : > { %v2707_v63 = vpop.xlane.xlu1 %2706 }
0x1d5b   : > { %v2708_v1 = vmul.f32 0.03125, %v2707_v63 }
0x1d5d   : > { %v2709_v2 = vadd.f32 1e-06, %v2708_v1 }
0x1d5f   : > { %3526 = vrsqrt.f32 %v2709_v2 }
0x1d69   : > { %v3527_v3 = vpop.eup %3526 }
0x1d6a   : > { %v2711_v5 = vmul.f32 %v3527_v3, %v2703_v59 }
0x1d6c   : > { %v2718_v9 = vmul.f32 %v3103_v4, %v2711_v5 }
0x1d6e   : > { %v2725_v10 = vadd.f32 %v3104_v6, %v2718_v9 }
0x1d70   : > { %v2726_v11 = vpack.c.bf16 %v2725_v10, %v2725_v10 }
0x1d72   : > { %3373 = vmatmul.mubr.msk.bf16.vlgmr.msra.gmra.mrb[44].mxu1 %vm569_vm0, %v2726_v11 }
0x1e45   : > { %v2789_v16 = vpop.f32.mrb[44].mxu1 }
0x1e46   : > { %v2790_v17 = vadd.f32 %v3109_v0, %v2789_v16  ;;  %v3374_v18 = vpop.f32.mrb[45].mxu1 }
0x1e47   : > { %v2792_v19 = vpop.f32.mrb[46].mxu1 }
0x1e48   : > { %v2796_v20 = vmul.f32 0.70710677, %v2790_v17  ;;  %v3375_v21 = vpop.f32.mrb[47].mxu1  ;;  %v2795_v24 = vmul.f32 0.5, %v2790_v17 }
0x1e4a   : > { %3528 = verf.f32 %v2796_v20 }
0x1e54   : > { %v3529_v23 = vpop.eup %3528 }
0x1e55   : > { %v2798_v25 = vadd.f32 1.0, %v3529_v23 }
0x1e57   : > { %v2799_v26 = vmul.f32 %v2798_v25, %v2795_v24 }
0x1e59   : > { %v2800_v27 = vpack.c.bf16 %v2799_v26, %v2799_v26 }
0x1e5b   : > { %3385 = vmatmul.mubr.msk.bf16.vlgmr.msra.gmra.mrb[40].mxu0 %vm1678_vm4, %v2800_v27 }
0x1f2e   : > { %v2879_v28 = vpop.f32.mrb[40].mxu0 }
0x1f2f   : > { %v2880_v30 = vadd.f32 %v3122_v8, %v2879_v28  ;;  %v3386_v31 = vpop.f32.mrb[41].mxu0 }
0x1f30   : > { %v2882_v32 = vpop.f32.mrb[42].mxu0 }
0x1f31   : > { %v3387_v33 = vpop.f32.mrb[43].mxu0  ;;  %v2885_v34 = vadd.f32 %v2880_v30, %v2694_v56 }
0x1f33   : > { %v2888_v35 = vsel %vm569_vm0, %v2885_v34, 0.0 }
0x1f34   : > { %2889 = vadd.xlane.f32.xlu1 %v2888_v35 }
0x1fc1   : > { %v2890_v36 = vpop.xlane.xlu1 %2889 }
0x1fc2   : > { %v2891_v37 = vmul.f32 0.03125, %v2890_v36 }
0x1fc4   : > { %v2892_v38 = vsub.f32 %v2885_v34, %v2891_v37 }
0x1fc6   : > { %v2893_v39 = vmul.f32 %v2892_v38, %v2892_v38 }
0x1fc8   : > { %v2894_v40 = vsel %vm569_vm0, %v2893_v39, 0.0 }
0x1fc9   : > { %2895 = vadd.xlane.f32.xlu1 %v2894_v40 }
0x2056   : > { %v2896_v29 = vpop.xlane.xlu1 %2895 }
0x2057   : > { %v2897_v41 = vmul.f32 0.03125, %v2896_v29 }
0x2059   : > { %v2898_v42 = vadd.f32 1e-06, %v2897_v41 }
0x205b   : > { %3530 = vrsqrt.f32 %v2898_v42 }
0x2065   : > { %v3531_v43 = vpop.eup %3530 }
0x2066   : > { %v2900_v44 = vmul.f32 %v3531_v43, %v2892_v38 }
0x2068   : > { %v2907_v46 = vmul.f32 %v3128_v7, %v2900_v44 }
0x206a   : > { %v2914_v47 = vadd.f32 %v3129_v45, %v2907_v46 }
0x206c   : > { %2915 = vst.msk [vmem:[%s563_s0] sm:$0xff] %vm569_vm0, %v2914_v47 }
0x206d   : > { %3631 = shalt.err (!%p3628_p7)
}
0x206e   : > { %s3632_s15 = scalar_lea.hbm %s4338_s3, 128  ;;  %s3636_s16 = scalar_lea.hbm %s4450_s2, 256 }
0x206f   : > { %p3633_p10 = scmp.ne.s32.totalorder %s4338_s3, %s3632_s15  ;;  %p3637_p0 = scmp.lt.u32.totalorder %s4338_s3, %s4450_s2 }
0x2070   : > { %p3638_p11 = scmp.lt.u32.totalorder %s3636_s16, %s3632_s15  ;;  %p3640_p2 = scmp.lt.u32.totalorder %s3632_s15, %s4338_s3 }
0x2071   : > { %p3634_p13 = pnand %p3633_p10, %p3907_p4 }
0x2072   : > { %p3639_p9 = por %p3638_p11, %p3637_p0 }
0x2073   : > { %p3635_p5 = pneg %p3634_p13 }
0x2074   : > { %p3641_p1 = por %p3640_p2, %p3639_p9 }
0x2076   : > { %p3642_p6 = pnand %p3641_p1, %p3635_p5 }
0x2078   : > { %3645 = shalt.err (!%p3642_p6)
}
0x2079   : > { %3398 = dma.vmem_to_hbm [thread:$0]  (%p3907_p4), %s4340_s26, 128, %s4338_s3, %s2917_s14  }
0x207a PF: > { %s4451_s30 = sld [smem:[#allocation12_spill]]  ;;  %s4452_s18 = sld [smem:[#allocation13_spill]] }
0x207b   : > { %p4454_p12 = scmp.ge.s32.totalorder %s3688_s24, 2 }
0x2080   : > { %s2942_s19 = sand.u32 1, %s4451_s30   ;;  %p4453_p8 = scmp.ne.s32.totalorder %s4452_s18, 0 }
0x2081   : > { %s2943_s25 = scalar_lea.sflag [#allocation4], %s2942_s19 }
0x2082   : > { %p3412_p3 = pnand %p4454_p12, %p4453_p8 }
0x2084   : > { %3671 = dma.done.wait (!%p3412_p3), %s2943_s25, 128  }
0x2085   : > { %3673 = vsyncadd (!%p3412_p3), %s2943_s25, 4294967168  ;;  %s4455_s1 = sld [smem:[#allocation14_spill]]  ;;  %p30_p7 = scmp.ge.s32.totalorder %s3897_s28, 4  }
0x2086   : > { %s4456_s21 = smov %s3680_s22  ;;  %s4457_s22 = smov %s3684_s23 }
0x2087   : > { %s4459_s24 = smov %s3897_s28  ;;  %32 = sbr.rel (!%p30_p7) target bundleno = 15 (0xf), region = 149 }
0x208b   : > { %s4458_s23 = smov %s4455_s1 }
0x208e   :  { %2948 = vsyncpa [#allocation3], 1 }
0x208f   :  { %2950 = vsyncpa [#allocation3 + $0x1], 1 }
0x2090   :  { %2951 = vsyncpa [#allocation6], 1 }
0x2091   :  { %2952 = vsyncpa [#allocation4], 1 }
0x2092   :  { %2954 = vsyncpa [#allocation4 + $0x1], 1 }

</bundles_post_ra>
